<compile_context>
chip_gen: v7x
topology: tpu7x:2x2x1
jax: 0.10.0
libtpu: 0.0.40
codegen_flags: <defaults>
</compile_context>

<pallas_src>
import functools

import jax
import jax.numpy as jnp
import numpy as np
from jax.experimental import pallas as pl
from jax.experimental.pallas import tpu as pltpu


def _rup(x, m):
    return (x + m - 1) // m * m


# ----------------------------------------------------------------------------
# Kernel 1: attention + single GRU step. Grid-less (everything is tiny and
# lane/sublane aligned); emits the fused fc_out input slab, new hidden, attn.
# ----------------------------------------------------------------------------
def _attn_gru_kernel(emb_ref, hid_ref, enc_ref, encproj_ref,
                     wa_h_ref, v_ref,
                     w_ih_ref, b_ih_ref, w_hh_ref, b_hh_ref,
                     fcin_ref, hnew_ref, attn_ref,
                     *, L_valid, Hdp):
    emb = emb_ref[...]          # [Bp, Ep]
    hid = hid_ref[...]          # [Bp, Hdp]
    enc = enc_ref[...]          # [Bp, Lp, D2p]
    encp = encproj_ref[...]     # [Bp, Lp, Hdp]   (already includes attention bias)
    Bp, Lp, _ = enc.shape

    # ---------------- Bahdanau attention ----------------
    hid_proj = jnp.dot(hid, wa_h_ref[...], preferred_element_type=jnp.float32)   # [Bp, Hdp]
    energy = jnp.tanh(encp + hid_proj[:, None, :])                                # [Bp, Lp, Hdp]
    score = jnp.sum(energy * v_ref[...][None, :, :], axis=2)                      # [Bp, Lp]

    # Mask padded sequence positions so softmax only covers real timesteps.
    lane_ids = jax.lax.broadcasted_iota(jnp.int32, (Bp, Lp), 1)
    score = jnp.where(lane_ids < L_valid, score, jnp.float32(-1e30))
    score = score - jnp.max(score, axis=1, keepdims=True)
    p = jnp.exp(score)
    a = p * pl.reciprocal(jnp.sum(p, axis=1, keepdims=True), approx=True)         # [Bp, Lp]
    attn_ref[...] = a

    # weighted = bmm(a, enc)  (reduce over the sublane axis L)
    weighted = jnp.sum(a[:, :, None] * enc, axis=1)                                # [Bp, D2p]

    # ---------------- single GRU step, fused gate matmuls (gate order r, z, n) ----------------
    rnn_in = jnp.concatenate([emb, weighted], axis=1)                              # [Bp, Ep+D2p]
    gi = jnp.dot(rnn_in, w_ih_ref[...], preferred_element_type=jnp.float32) + b_ih_ref[...]
    gh = jnp.dot(hid, w_hh_ref[...], preferred_element_type=jnp.float32) + b_hh_ref[...]

    r = jax.nn.sigmoid(gi[:, 0:Hdp] + gh[:, 0:Hdp])
    z = jax.nn.sigmoid(gi[:, Hdp:2 * Hdp] + gh[:, Hdp:2 * Hdp])
    n = jnp.tanh(gi[:, 2 * Hdp:3 * Hdp] + r * gh[:, 2 * Hdp:3 * Hdp])
    h_new = (1.0 - z) * n + z * hid                                                # [Bp, Hdp]
    hnew_ref[...] = h_new

    # fc_out input slab [h_new ; weighted ; emb]  (matches fused fc weight row layout)
    fcin_ref[...] = jnp.concatenate([h_new, weighted, emb], axis=1)                # [Bp, Kp]


# ----------------------------------------------------------------------------
# Kernel 2: fc_out as a single fused matmul, tiled over the (padded) vocab dim.
# ----------------------------------------------------------------------------
def _fc_out_kernel(fcin_ref, w_ref, b_ref, pred_ref):
    pred_ref[...] = (jnp.dot(fcin_ref[...], w_ref[...], preferred_element_type=jnp.float32)
                     + b_ref[...])


# ----------------------------------------------------------------------------
# One-time parameter preparation: pad to (8,128) tiles and fuse per-gate /
# per-part weights into single matmul operands.
# ----------------------------------------------------------------------------
def prepare_decoder_params(params, lane=128):
    E = params["embedding"].shape[1]
    Hd = params["attn_w_h"].shape[0]
    D2 = params["attn_w_e"].shape[0]
    O = params["fc_w_o"].shape[1]
    V = params["embedding"].shape[0]

    Ep, Hdp, D2p, Op = _rup(E, lane), _rup(Hd, lane), _rup(D2, lane), _rup(O, lane)
    Kp = Hdp + D2p + Ep

    def pad2(w, r, c):
        out = jnp.zeros((r, c), jnp.float32)
        return out.at[:w.shape[0], :w.shape[1]].set(w.astype(jnp.float32))

    embedding = pad2(params["embedding"], V, Ep)                      # [V, Ep]

    attn_w_h = pad2(params["attn_w_h"], Hdp, Hdp)
    attn_w_e = pad2(params["attn_w_e"], D2p, Hdp)
    attn_b = pad2(params["attn_b"], 1, Hdp)
    attn_v = pad2(params["attn_v"], 1, Hdp)

    # Fused GRU weights.  K layout of W_ih = [emb (Ep rows) ; weighted (D2p rows)],
    # N layout = [r | z | n] blocks of Hdp columns each.
    w_ih = jnp.zeros((Ep + D2p, 3 * Hdp), jnp.float32)
    w_hh = jnp.zeros((Hdp, 3 * Hdp), jnp.float32)
    b_ih = jnp.zeros((1, 3 * Hdp), jnp.float32)
    b_hh = jnp.zeros((1, 3 * Hdp), jnp.float32)
    for g in range(3):
        c0 = g * Hdp
        w_ih = w_ih.at[:E, c0:c0 + Hd].set(params["gru_w_ih_e"][g].astype(jnp.float32))
        w_ih = w_ih.at[Ep:Ep + D2, c0:c0 + Hd].set(params["gru_w_ih_w"][g].astype(jnp.float32))
        w_hh = w_hh.at[:Hd, c0:c0 + Hd].set(params["gru_w_hh"][g].astype(jnp.float32))
        b_ih = b_ih.at[:, c0:c0 + Hd].set(params["gru_b_ih"][g].astype(jnp.float32))
        b_hh = b_hh.at[:, c0:c0 + Hd].set(params["gru_b_hh"][g].astype(jnp.float32))

    # Fused fc_out weight.  K layout = [h_new (Hdp) ; weighted (D2p) ; emb (Ep)].
    # For v6e/v7x large-vocab deployments, cast w_fc to bf16 here (accumulation stays f32).
    w_fc = jnp.zeros((Kp, Op), jnp.float32)
    w_fc = w_fc.at[:Hd, :O].set(params["fc_w_o"].astype(jnp.float32))
    w_fc = w_fc.at[Hdp:Hdp + D2, :O].set(params["fc_w_w"].astype(jnp.float32))
    w_fc = w_fc.at[Hdp + D2p:Hdp + D2p + E, :O].set(params["fc_w_e"].astype(jnp.float32))
    b_fc = pad2(params["fc_b"], 1, Op)

    return dict(embedding=embedding,
                attn_w_h=attn_w_h, attn_w_e=attn_w_e, attn_b=attn_b, attn_v=attn_v,
                gru_w_ih=w_ih, gru_b_ih=b_ih, gru_w_hh=w_hh, gru_b_hh=b_hh,
                fc_w=w_fc, fc_b=b_fc,
                dims=dict(E=E, Hd=Hd, D2=D2, O=O, Ep=Ep, Hdp=Hdp, D2p=D2p, Op=Op, Kp=Kp))


# ----------------------------------------------------------------------------
# Once-per-sequence encoder preparation (hoisted out of the decode step):
# seq-major -> batch-major, pad, and precompute enc @ W_e + b.
# ----------------------------------------------------------------------------
def precompute_encoder(encoder_outputs, pp):
    L, B, D2 = encoder_outputs.shape
    d = pp["dims"]
    Bp, Lp = _rup(B, 8), _rup(L, 8)
    enc = jnp.transpose(encoder_outputs, (1, 0, 2)).astype(jnp.float32)         # [B, L, D2]
    enc_pad = jnp.zeros((Bp, Lp, d["D2p"]), jnp.float32).at[:B, :L, :D2].set(enc)
    enc_proj = (jnp.einsum("bld,dh->blh", enc_pad, pp["attn_w_e"])
                + pp["attn_b"][None, :, :])                                      # [Bp, Lp, Hdp]
    return enc_pad, enc_proj, L


# ----------------------------------------------------------------------------
# One decode step.
# ----------------------------------------------------------------------------
def decoder_step(tokens, hidden, enc_pad, enc_proj, L_valid, pp):
    d = pp["dims"]
    B = tokens.shape[0]
    Bp, Lp = enc_pad.shape[0], enc_pad.shape[1]
    Hd, O = d["Hd"], d["O"]
    Ep, Hdp, Op, Kp = d["Ep"], d["Hdp"], d["Op"], d["Kp"]

    # Embedding lookup (dropout == identity in inference); pad batch to Bp sublanes.
    # TODO(synk): for very large vocabularies move this gather into the Pallas pipeline
    # via PrefetchScalarGridSpec + pl.Element row-gather instead of an XLA gather.
    emb = jnp.take(pp["embedding"], tokens, axis=0)                              # [B, Ep]
    emb_p = jnp.zeros((Bp, Ep), jnp.float32).at[:B].set(emb)
    hid_p = jnp.zeros((Bp, Hdp), jnp.float32).at[:B, :Hd].set(hidden.astype(jnp.float32))

    vmem = pl.BlockSpec(memory_space=pltpu.MemorySpace.VMEM)
    kernel1 = functools.partial(_attn_gru_kernel, L_valid=L_valid, Hdp=Hdp)

    fc_in, h_new_p, a_p = pl.pallas_call(
        kernel1,
        out_shape=(jax.ShapeDtypeStruct((Bp, Kp), jnp.float32),
                   jax.ShapeDtypeStruct((Bp, Hdp), jnp.float32),
                   jax.ShapeDtypeStruct((Bp, Lp), jnp.float32)),
        in_specs=[vmem] * 10,
        out_specs=(vmem, vmem, vmem),
    )(emb_p, hid_p, enc_pad, enc_proj,
      pp["attn_w_h"], pp["attn_v"],
      pp["gru_w_ih"], pp["gru_b_ih"], pp["gru_w_hh"], pp["gru_b_hh"])

    # fc_out: tile the padded vocab dim (lane-dense output, auto-pipelined weight DMA,
    # "parallel" so v7x's two TensorCores split the vocab tiles).
    # Tile sized conservatively so double-buffered weight tiles stay well under the
    # 32 MiB scoped VMEM default on v6e/v7x (re-derive for v7x's 64 MiB physical VMEM).
    TILE_O = 512 if Op % 512 == 0 else (256 if Op % 256 == 0 else 128)
    pred_p = pl.pallas_call(
        _fc_out_kernel,
        out_shape=jax.ShapeDtypeStruct((Bp, Op), jnp.float32),
        grid=(Op // TILE_O,),
        in_specs=[pl.BlockSpec((Bp, Kp), lambda j: (0, 0)),
                  pl.BlockSpec((Kp, TILE_O), lambda j: (0, j)),
                  pl.BlockSpec((1, TILE_O), lambda j: (0, j))],
        out_specs=pl.BlockSpec((Bp, TILE_O), lambda j: (0, j)),
        compiler_params=pltpu.CompilerParams(dimension_semantics=("parallel",)),
    )(fc_in, pp["fc_w"], pp["fc_b"])

    return pred_p[:B, :O], h_new_p[:B, :Hd], a_p[:B, :L_valid]


def decoder_forward(tokens, hidden, encoder_outputs, params):
    """Full forward matching the PyTorch module: (prediction, new_hidden, attention)."""
    pp = prepare_decoder_params(params)
    enc_pad, enc_proj, L = precompute_encoder(encoder_outputs, pp)
    return decoder_step(tokens, hidden, enc_pad, enc_proj, L, pp)


# ----------------------------------------------------------------------------
# Pure-JAX reference mirroring the PyTorch forward semantics.
# ----------------------------------------------------------------------------
def decoder_reference(tokens, hidden, encoder_outputs, params):
    emb = params["embedding"][tokens]                            # [B, E]
    enc = jnp.transpose(encoder_outputs, (1, 0, 2))              # [B, L, 2*He]
    hid_proj = hidden @ params["attn_w_h"]
    enc_proj = jnp.einsum("bld,dh->blh", enc, params["attn_w_e"])
    energy = jnp.tanh(enc_proj + hid_proj[:, None, :] + params["attn_b"][None, :, :])
    score = jnp.sum(energy * params["attn_v"][None, :, :], axis=2)
    a = jax.nn.softmax(score, axis=1)
    weighted = jnp.einsum("bl,bld->bd", a, enc)

    def gate(i):
        gi = emb @ params["gru_w_ih_e"][i] + weighted @ params["gru_w_ih_w"][i] + params["gru_b_ih"][i]
        gh = hidden @ params["gru_w_hh"][i] + params["gru_b_hh"][i]
        return gi, gh

    gi_r, gh_r = gate(0)
    gi_z, gh_z = gate(1)
    gi_n, gh_n = gate(2)
    r = jax.nn.sigmoid(gi_r + gh_r)
    z = jax.nn.sigmoid(gi_z + gh_z)
    n = jnp.tanh(gi_n + r * gh_n)
    h_new = (1.0 - z) * n + z * hidden
    pred = (h_new @ params["fc_w_o"] + weighted @ params["fc_w_w"]
            + emb @ params["fc_w_e"] + params["fc_b"])
    return pred, h_new, a


if __name__ == "__main__":
    # Small shapes consistent with the module's forward.
    B, L = 4, 8
    output_dim, emb_dim, enc_hid_dim, dec_hid_dim = 24, 16, 16, 32
    He2 = 2 * enc_hid_dim

    key = jax.random.PRNGKey(0)
    ks = jax.random.split(key, 20)

    def init(k, shape, s=0.2):
        return (jax.random.normal(k, shape) * s).astype(jnp.float32)

    params = dict(
        embedding=init(ks[0], (output_dim, emb_dim)),
        # attention:  Linear(2*He + Hd -> Hd) split into hidden / encoder parts, plus v.
        attn_w_h=init(ks[1], (dec_hid_dim, dec_hid_dim)),
        attn_w_e=init(ks[2], (He2, dec_hid_dim)),
        attn_b=init(ks[3], (1, dec_hid_dim)),
        attn_v=init(ks[4], (1, dec_hid_dim)),
        # GRU(emb + 2*He -> Hd): per-gate weights stacked on leading axis (r, z, n).
        gru_w_ih_e=init(ks[5], (3, emb_dim, dec_hid_dim)),
        gru_w_ih_w=init(ks[6], (3, He2, dec_hid_dim)),
        gru_b_ih=init(ks[7], (3, 1, dec_hid_dim)),
        gru_w_hh=init(ks[8], (3, dec_hid_dim, dec_hid_dim)),
        gru_b_hh=init(ks[9], (3, 1, dec_hid_dim)),
        # fc_out(Hd + 2*He + emb -> output_dim) split into the three concatenated parts.
        fc_w_o=init(ks[10], (dec_hid_dim, output_dim)),
        fc_w_w=init(ks[11], (He2, output_dim)),
        fc_w_e=init(ks[12], (emb_dim, output_dim)),
        fc_b=init(ks[13], (1, output_dim)),
    )

    tokens = jax.random.randint(ks[14], (B,), 0, output_dim, dtype=jnp.int32)
    hidden = init(ks[15], (B, dec_hid_dim), 0.5)
    encoder_outputs = init(ks[16], (L, B, He2), 0.5)

    pred, h_new, a = jax.block_until_ready(
        decoder_forward(tokens, hidden, encoder_outputs, params))
    ref_pred, ref_h, ref_a = decoder_reference(tokens, hidden, encoder_outputs, params)

    assert pred.shape == (B, output_dim)
    assert h_new.shape == (B, dec_hid_dim)
    assert a.shape == (B, L)
    assert np.allclose(np.asarray(pred), np.asarray(ref_pred), rtol=2e-2, atol=2e-2)
    assert np.allclose(np.asarray(h_new), np.asarray(ref_h), rtol=2e-2, atol=2e-2)
    assert np.allclose(np.asarray(a), np.asarray(ref_a), rtol=2e-2, atol=2e-2)
    print("KERNEL_OK")
</pallas_src>

<mosaic_0001>
module attributes {stable_mosaic.version = 11 : i64} {
  func.func @_attn_gru_kernel(%arg0: memref<8x128xf32, #tpu.memory_space<vmem>>, %arg1: memref<8x128xf32, #tpu.memory_space<vmem>>, %arg2: memref<8x8x128xf32, #tpu.memory_space<vmem>>, %arg3: memref<8x8x128xf32, #tpu.memory_space<vmem>>, %arg4: memref<128x128xf32, #tpu.memory_space<vmem>>, %arg5: memref<1x128xf32, #tpu.memory_space<vmem>>, %arg6: memref<256x384xf32, #tpu.memory_space<vmem>>, %arg7: memref<1x384xf32, #tpu.memory_space<vmem>>, %arg8: memref<128x384xf32, #tpu.memory_space<vmem>>, %arg9: memref<1x384xf32, #tpu.memory_space<vmem>>, %arg10: memref<8x384xf32, #tpu.memory_space<vmem>>, %arg11: memref<8x128xf32, #tpu.memory_space<vmem>>, %arg12: memref<8x8xf32, #tpu.memory_space<vmem>>) attributes {dimension_semantics = [], scalar_prefetch = 0 : i64, scratch_operands = 0 : i64, tpu.core_type = #tpu.core_type<tc>} {
    %c0 = arith.constant 0 : index
    %c0_0 = arith.constant 0 : index
    %0 = vector.load %arg0[%c0, %c0_0] : memref<8x128xf32, #tpu.memory_space<vmem>>, vector<8x128xf32>
    %c0_1 = arith.constant 0 : index
    %c0_2 = arith.constant 0 : index
    %1 = vector.load %arg1[%c0_1, %c0_2] : memref<8x128xf32, #tpu.memory_space<vmem>>, vector<8x128xf32>
    %c0_3 = arith.constant 0 : index
    %c0_4 = arith.constant 0 : index
    %c0_5 = arith.constant 0 : index
    %2 = vector.load %arg2[%c0_3, %c0_4, %c0_5] : memref<8x8x128xf32, #tpu.memory_space<vmem>>, vector<8x8x128xf32>
    %c0_6 = arith.constant 0 : index
    %c0_7 = arith.constant 0 : index
    %c0_8 = arith.constant 0 : index
    %3 = vector.load %arg3[%c0_6, %c0_7, %c0_8] : memref<8x8x128xf32, #tpu.memory_space<vmem>>, vector<8x8x128xf32>
    %c0_9 = arith.constant 0 : index
    %c0_10 = arith.constant 0 : index
    %4 = vector.load %arg4[%c0_9, %c0_10] : memref<128x128xf32, #tpu.memory_space<vmem>>, vector<128x128xf32>
    %cst = arith.constant dense<0.000000e+00> : vector<8x128xf32>
    %5 = tpu.matmul %1, %4, %cst {dimension_numbers = #tpu.dot_dimension_numbers<[1], [0], [0], [1], [0, 0, 1, 1], [], []>} : vector<8x128xf32>, vector<128x128xf32>, vector<8x128xf32> -> vector<8x128xf32>
    %6 = vector.shape_cast %5 : vector<8x128xf32> to vector<8x1x128xf32>
    %7 = vector.broadcast %6 : vector<8x1x128xf32> to vector<8x8x128xf32>
    %8 = arith.addf %3, %7 : vector<8x8x128xf32>
    %9 = math.tanh %8 : vector<8x8x128xf32>
    %c0_11 = arith.constant 0 : index
    %c0_12 = arith.constant 0 : index
    %10 = vector.load %arg5[%c0_11, %c0_12] : memref<1x128xf32, #tpu.memory_space<vmem>>, vector<1x128xf32>
    %11 = vector.shape_cast %10 : vector<1x128xf32> to vector<1x1x128xf32>
    %12 = vector.broadcast %11 : vector<1x1x128xf32> to vector<8x8x128xf32>
    %13 = arith.mulf %9, %12 : vector<8x8x128xf32>
    %cst_13 = arith.constant dense<0.000000e+00> : vector<8x8xf32>
    %14 = vector.multi_reduction <add>, %13, %cst_13 [2] : vector<8x8x128xf32> to vector<8x8xf32>
    %15 = tpu.iota {dimensions = array<i32: 1>} : vector<8x8xi32>
    %c8_i32 = arith.constant 8 : i32
    %16 = vector.broadcast %c8_i32 : i32 to vector<8x8xi32>
    %17 = arith.cmpi slt, %15, %16 : vector<8x8xi32>
    %cst_14 = arith.constant -1.000000e+30 : f32
    %18 = vector.broadcast %cst_14 : f32 to vector<8x8xf32>
    %19 = arith.select %17, %14, %18 : vector<8x8xi1>, vector<8x8xf32>
    %cst_15 = arith.constant dense<0xFF800000> : vector<8xf32>
    %20 = vector.multi_reduction <maximumf>, %19, %cst_15 [1] : vector<8x8xf32> to vector<8xf32>
    %21 = vector.shape_cast %20 : vector<8xf32> to vector<8x1xf32>
    %22 = vector.broadcast %21 : vector<8x1xf32> to vector<8x8xf32>
    %23 = arith.subf %19, %22 : vector<8x8xf32>
    %24 = math.exp %23 : vector<8x8xf32>
    %cst_16 = arith.constant dense<0.000000e+00> : vector<8xf32>
    %25 = vector.multi_reduction <add>, %24, %cst_16 [1] : vector<8x8xf32> to vector<8xf32>
    %26 = vector.shape_cast %25 : vector<8xf32> to vector<8x1xf32>
    %27 = tpu.reciprocal %26 {approx = true} : vector<8x1xf32> -> vector<8x1xf32>
    %28 = vector.broadcast %27 : vector<8x1xf32> to vector<8x8xf32>
    %29 = arith.mulf %24, %28 : vector<8x8xf32>
    %c0_17 = arith.constant 0 : index
    %c0_18 = arith.constant 0 : index
    %30 = vector.load %arg12[%c0_17, %c0_18] : memref<8x8xf32, #tpu.memory_space<vmem>>, vector<8x8xf32>
    tpu.vector_store %arg12[%c0_17, %c0_18], %29 {strides = array<i32>} : memref<8x8xf32, #tpu.memory_space<vmem>>, vector<8x8xf32>,
    %31 = vector.shape_cast %29 : vector<8x8xf32> to vector<8x8x1xf32>
    %32 = vector.broadcast %31 : vector<8x8x1xf32> to vector<8x8x128xf32>
    %33 = arith.mulf %32, %2 : vector<8x8x128xf32>
    %cst_19 = arith.constant dense<0.000000e+00> : vector<8x128xf32>
    %34 = vector.multi_reduction <add>, %33, %cst_19 [1] : vector<8x8x128xf32> to vector<8x128xf32>
    %35 = tpu.concatenate %0, %34 in 1 : vector<8x128xf32>, vector<8x128xf32> -> vector<8x256xf32>
    %c0_20 = arith.constant 0 : index
    %c0_21 = arith.constant 0 : index
    %36 = vector.load %arg6[%c0_20, %c0_21] : memref<256x384xf32, #tpu.memory_space<vmem>>, vector<256x384xf32>
    %cst_22 = arith.constant dense<0.000000e+00> : vector<8x384xf32>
    %37 = tpu.matmul %35, %36, %cst_22 {dimension_numbers = #tpu.dot_dimension_numbers<[1], [0], [0], [1], [0, 0, 1, 1], [], []>} : vector<8x256xf32>, vector<256x384xf32>, vector<8x384xf32> -> vector<8x384xf32>
    %c0_23 = arith.constant 0 : index
    %c0_24 = arith.constant 0 : index
    %38 = vector.load %arg7[%c0_23, %c0_24] : memref<1x384xf32, #tpu.memory_space<vmem>>, vector<1x384xf32>
    %39 = vector.broadcast %38 : vector<1x384xf32> to vector<8x384xf32>
    %40 = arith.addf %37, %39 : vector<8x384xf32>
    %c0_25 = arith.constant 0 : index
    %c0_26 = arith.constant 0 : index
    %41 = vector.load %arg8[%c0_25, %c0_26] : memref<128x384xf32, #tpu.memory_space<vmem>>, vector<128x384xf32>
    %cst_27 = arith.constant dense<0.000000e+00> : vector<8x384xf32>
    %42 = tpu.matmul %1, %41, %cst_27 {dimension_numbers = #tpu.dot_dimension_numbers<[1], [0], [0], [1], [0, 0, 1, 1], [], []>} : vector<8x128xf32>, vector<128x384xf32>, vector<8x384xf32> -> vector<8x384xf32>
    %c0_28 = arith.constant 0 : index
    %c0_29 = arith.constant 0 : index
    %43 = vector.load %arg9[%c0_28, %c0_29] : memref<1x384xf32, #tpu.memory_space<vmem>>, vector<1x384xf32>
    %44 = vector.broadcast %43 : vector<1x384xf32> to vector<8x384xf32>
    %45 = arith.addf %42, %44 : vector<8x384xf32>
    %46 = vector.extract_strided_slice %40 {offsets = [0, 0], sizes = [8, 128], strides = [1, 1]} : vector<8x384xf32> to vector<8x128xf32>
    %47 = vector.extract_strided_slice %45 {offsets = [0, 0], sizes = [8, 128], strides = [1, 1]} : vector<8x384xf32> to vector<8x128xf32>
    %48 = arith.addf %46, %47 : vector<8x128xf32>
    %49 = arith.negf %48 : vector<8x128xf32>
    %50 = math.exp %49 : vector<8x128xf32>
    %cst_30 = arith.constant 1.000000e+00 : f32
    %51 = vector.broadcast %cst_30 : f32 to vector<8x128xf32>
    %52 = arith.addf %51, %50 : vector<8x128xf32>
    %53 = arith.divf %51, %52 : vector<8x128xf32>
    %54 = vector.extract_strided_slice %40 {offsets = [0, 128], sizes = [8, 128], strides = [1, 1]} : vector<8x384xf32> to vector<8x128xf32>
    %55 = vector.extract_strided_slice %45 {offsets = [0, 128], sizes = [8, 128], strides = [1, 1]} : vector<8x384xf32> to vector<8x128xf32>
    %56 = arith.addf %54, %55 : vector<8x128xf32>
    %57 = arith.negf %56 : vector<8x128xf32>
    %58 = math.exp %57 : vector<8x128xf32>
    %cst_31 = arith.constant 1.000000e+00 : f32
    %59 = vector.broadcast %cst_31 : f32 to vector<8x128xf32>
    %60 = arith.addf %59, %58 : vector<8x128xf32>
    %61 = arith.divf %59, %60 : vector<8x128xf32>
    %62 = vector.extract_strided_slice %40 {offsets = [0, 256], sizes = [8, 128], strides = [1, 1]} : vector<8x384xf32> to vector<8x128xf32>
    %63 = vector.extract_strided_slice %45 {offsets = [0, 256], sizes = [8, 128], strides = [1, 1]} : vector<8x384xf32> to vector<8x128xf32>
    %64 = arith.mulf %53, %63 : vector<8x128xf32>
    %65 = arith.addf %62, %64 : vector<8x128xf32>
    %66 = math.tanh %65 : vector<8x128xf32>
    %cst_32 = arith.constant 1.000000e+00 : f32
    %67 = vector.broadcast %cst_32 : f32 to vector<8x128xf32>
    %68 = arith.subf %67, %61 : vector<8x128xf32>
    %69 = arith.mulf %68, %66 : vector<8x128xf32>
    %70 = arith.mulf %61, %1 : vector<8x128xf32>
    %71 = arith.addf %69, %70 : vector<8x128xf32>
    %c0_33 = arith.constant 0 : index
    %c0_34 = arith.constant 0 : index
    %72 = vector.load %arg11[%c0_33, %c0_34] : memref<8x128xf32, #tpu.memory_space<vmem>>, vector<8x128xf32>
    tpu.vector_store %arg11[%c0_33, %c0_34], %71 {strides = array<i32>} : memref<8x128xf32, #tpu.memory_space<vmem>>, vector<8x128xf32>,
    %73 = tpu.concatenate %71, %34, %0 in 1 : vector<8x128xf32>, vector<8x128xf32>, vector<8x128xf32> -> vector<8x384xf32>
    %c0_35 = arith.constant 0 : index
    %c0_36 = arith.constant 0 : index
    %74 = vector.load %arg10[%c0_35, %c0_36] : memref<8x384xf32, #tpu.memory_space<vmem>>, vector<8x384xf32>
    tpu.vector_store %arg10[%c0_35, %c0_36], %73 {strides = array<i32>} : memref<8x384xf32, #tpu.memory_space<vmem>>, vector<8x384xf32>,
    return
  }
}

</mosaic_0001>

<bundles_post_ra>
// kernel: tpu_custom_call.1
= control target key start
LH: loop header
LB: loop body
LE: loop exit
PB: predicated region body
PF: predicated region fallthrough
CT: control target
= control target key end

     0   :  { %18 = vsyncpa [#allocation3], 0  ;;  %s2043_s0 = inlined_call_operand.hbm [shape: f32[8,128], index: 0, kind: input, shape index: {}]   ;;  %s2044_s1 = inlined_call_operand.hbm [shape: f32[8,128], index: 1, kind: input, shape index: {}]   ;;  %s2045_s2 = inlined_call_operand.hbm [shape: f32[8,8,128], index: 2, kind: input, shape index: {}]   ;;  %s2046_s3 = inlined_call_operand.hbm [shape: f32[8,8,128], index: 3, kind: input, shape index: {}]   ;;  %s2047_s4 = inlined_call_operand.hbm [shape: f32[128,128], index: 4, kind: input, shape index: {}]   ;;  %s2048_s5 = inlined_call_operand.vmem [shape: f32[1,128], index: 5, kind: input, shape index: {}]   ;;  %s2049_s6 = inlined_call_operand.hbm [shape: f32[256,384], index: 6, kind: input, shape index: {}]   ;;  %s2050_s7 = inlined_call_operand.vmem [shape: f32[1,384], index: 7, kind: input, shape index: {}]   ;;  %s2051_s8 = inlined_call_operand.hbm [shape: f32[128,384], index: 8, kind: input, shape index: {}]   ;;  %s2052_s9 = inlined_call_operand.vmem [shape: f32[1,384], index: 9, kind: input, shape index: {}]   ;;  %s2053_s10 = inlined_call_operand.hbm [shape: f32[8,384], index: 10, kind: output, shape index: {0}]   ;;  %s2054_s11 = inlined_call_operand.hbm [shape: f32[8,128], index: 11, kind: output, shape index: {1}]   ;;  %s2055_s12 = inlined_call_operand.hbm [shape: f32[8,8], index: 12, kind: output, shape index: {2}]  }
   0x1   :  { %19 = vsyncpa [#allocation6], 0 }
   0x2   :  { %20 = vsyncpa [#allocation9], 0 }
   0x3   :  { %21 = vsyncpa [#allocation12], 0 }
   0x4   :  { %22 = vsyncpa [#allocation4], 0 }
   0x5   :  { %23 = vsyncpa [#allocation16], 0  ;;  %s1707_s21 = smov [#allocation5]   ;;  %s1475_s25 = scalar_lea.hbm %s2044_s1, 128 }
   0x6   :  { %s40_s22 = sshll.u32 %s1707_s21, 4  ;;  %p1476_p0 = scmp.ne.s32.totalorder %s2044_s1, %s1475_s25  ;;  %s41_s22 = int_to_ptr.vmem [resolvable:$true] %s40_s22 }
   0x7   :  { %p1479_p1 = scmp.lt.u32.totalorder %s1475_s25, %s2044_s1 }
   0x9   :  { %p1481_p2 = pnand %p1479_p1, %p1476_p0 }
   0xb   :  { %1484 = shalt.err (!%p1481_p2)
}
   0xc   :  { %s1485_s30 = scalar_lea.vmem %s41_s22, 128  ;;  %p1490_p4 = scmp.lt.s32.totalorder %s41_s22, %s41_s22 }
   0xd   :  { %p1486_p3 = scmp.ne.s32.totalorder %s41_s22, %s1485_s30  ;;  %p1491_p5 = scmp.lt.s32.totalorder %s1485_s30, %s1485_s30 }
   0xf   :  { %p1492_p6 = por %p1491_p5, %p1490_p4 }
  0x11   :  { %p1493_p7 = pnand %p1492_p6, %p1486_p3 }
  0x13   :  { %1496 = shalt.err (!%p1493_p7)
}
  0x14   :  { %43 = dma.hbm_to_vmem [thread:$0]  %s2044_s1, 128, %s41_s22, [#allocation6]  }
  0x15   :  { %s1708_s15 = smov [#allocation8]   ;;  %s1709_s17 = smov [#allocation11]  }
  0x16   :  { %s61_s16 = sshll.u32 %s1708_s15, 4  ;;  %s87_s18 = sshll.u32 %s1709_s17, 4  ;;  %s62_s16 = int_to_ptr.vmem [resolvable:$true] %s61_s16  ;;  %s88_s18 = int_to_ptr.vmem [resolvable:$true] %s87_s18 }
  0x17   :  { %s1497_s21 = scalar_lea.hbm %s2046_s3, 1024 }
  0x18   :  { %p1498_p8 = scmp.ne.s32.totalorder %s2046_s3, %s1497_s21  ;;  %p1501_p9 = scmp.lt.u32.totalorder %s1497_s21, %s2046_s3 }
  0x1a   :  { %p1503_p10 = pnand %p1501_p9, %p1498_p8 }
  0x1c   :  { %1506 = shalt.err (!%p1503_p10)
}
  0x1d   :  { %s1507_s1 = scalar_lea.vmem %s62_s16, 1024  ;;  %p1512_p12 = scmp.lt.s32.totalorder %s62_s16, %s62_s16 }
  0x1e   :  { %p1508_p11 = scmp.ne.s32.totalorder %s62_s16, %s1507_s1  ;;  %p1513_p13 = scmp.lt.s32.totalorder %s1507_s1, %s1507_s1 }
  0x20   :  { %p1514_p0 = por %p1513_p13, %p1512_p12 }
  0x22   :  { %p1515_p1 = pnand %p1514_p0, %p1508_p11 }
  0x24   :  { %1518 = shalt.err (!%p1515_p1)
}
  0x25   :  { %s1710_s22 = smov 128   ;;  %s1711_s27 = smov 8  }
  0x26   :  { %67 = dma.hbm_to_vmem [thread:$0]  %s2046_s3, 1024, %s62_s16, [#allocation9], %s1710_s22, %s1710_s22, %s1711_s27  }
  0x27   :  { %s1519_s14 = scalar_lea.hbm %s2049_s6, 12288 }
  0x28   :  { %p1520_p2 = scmp.ne.s32.totalorder %s2049_s6, %s1519_s14  ;;  %p1523_p3 = scmp.lt.u32.totalorder %s1519_s14, %s2049_s6 }
  0x2a   :  { %p1525_p4 = pnand %p1523_p3, %p1520_p2 }
  0x2c   :  { %1528 = shalt.err (!%p1525_p4)
}
  0x2d   :  { %s1529_s21 = scalar_lea.vmem %s88_s18, 12288  ;;  %p1534_p6 = scmp.lt.s32.totalorder %s88_s18, %s88_s18 }
  0x2e   :  { %p1530_p5 = scmp.ne.s32.totalorder %s88_s18, %s1529_s21  ;;  %p1535_p7 = scmp.lt.s32.totalorder %s1529_s21, %s1529_s21 }
  0x30   :  { %p1536_p8 = por %p1535_p7, %p1534_p6 }
  0x32   :  { %p1537_p9 = pnand %p1536_p8, %p1530_p5 }
  0x34   :  { %1540 = shalt.err (!%p1537_p9)
}
  0x35   :  { %s1712_s3 = smov 384   ;;  %s1713_s16 = smov 24  }
  0x36   :  { %93 = dma.hbm_to_vmem [thread:$0]  %s2049_s6, 12288, %s88_s18, [#allocation12], %s1712_s3, %s1712_s3, %s1713_s16  }
  0x37   :  { %s1714_s25 = smov [#allocation2]   ;;  %s1715_s1 = smov [#allocation7]  }
  0x38   :  { %s30_s26 = sshll.u32 %s1714_s25, 4  ;;  %s49_s28 = sshll.u32 %s1715_s1, 4  ;;  %s31_s26 = int_to_ptr.vmem [resolvable:$true] %s30_s26  ;;  %s50_s28 = int_to_ptr.vmem [resolvable:$true] %s49_s28 }
  0x39   :  { %s1541_s13 = scalar_lea.hbm %s2043_s0, 128 }
  0x3a   :  { %p1542_p10 = scmp.ne.s32.totalorder %s2043_s0, %s1541_s13  ;;  %p1545_p11 = scmp.lt.u32.totalorder %s1541_s13, %s2043_s0 }
  0x3c   :  { %p1547_p12 = pnand %p1545_p11, %p1542_p10 }
  0x3e   :  { %1550 = shalt.err (!%p1547_p12)
}
  0x3f   :  { %s1551_s6 = scalar_lea.vmem %s31_s26, 128  ;;  %p1556_p0 = scmp.lt.s32.totalorder %s31_s26, %s31_s26 }
  0x40   :  { %p1552_p13 = scmp.ne.s32.totalorder %s31_s26, %s1551_s6  ;;  %p1557_p1 = scmp.lt.s32.totalorder %s1551_s6, %s1551_s6 }
  0x42   :  { %p1558_p2 = por %p1557_p1, %p1556_p0 }
  0x44   :  { %p1559_p3 = pnand %p1558_p2, %p1552_p13 }
  0x46   :  { %1562 = shalt.err (!%p1559_p3)
}
  0x47   :  { %33 = dma.hbm_to_vmem [thread:$0]  %s2043_s0, 128, %s31_s26, [#allocation3]  }
  0x48   :  { %s1563_s24 = scalar_lea.hbm %s2045_s2, 1024 }
  0x49   :  { %p1564_p4 = scmp.ne.s32.totalorder %s2045_s2, %s1563_s24  ;;  %p1567_p5 = scmp.lt.u32.totalorder %s1563_s24, %s2045_s2 }
  0x4b   :  { %p1569_p6 = pnand %p1567_p5, %p1564_p4 }
  0x4d   :  { %1572 = shalt.err (!%p1569_p6)
}
  0x4e   :  { %s1573_s13 = scalar_lea.vmem %s50_s28, 1024  ;;  %p1578_p8 = scmp.lt.s32.totalorder %s50_s28, %s50_s28 }
  0x4f   :  { %p1574_p7 = scmp.ne.s32.totalorder %s50_s28, %s1573_s13  ;;  %p1579_p9 = scmp.lt.s32.totalorder %s1573_s13, %s1573_s13 }
  0x51   :  { %p1580_p10 = por %p1579_p9, %p1578_p8 }
  0x53   :  { %p1581_p11 = pnand %p1580_p10, %p1574_p7 }
  0x55   :  { %1584 = shalt.err (!%p1581_p11)
}
  0x56   :  { %55 = dma.hbm_to_vmem [thread:$0]  %s2045_s2, 1024, %s50_s28, [#allocation6], %s1710_s22, %s1710_s22, %s1711_s27  }
  0x57   :  { %s1716_s14 = smov [#allocation10]   ;;  %s1717_s17 = smov [#allocation13]  }
  0x58   :  { %s73_s15 = sshll.u32 %s1716_s14, 4  ;;  %s101_s19 = sshll.u32 %s1717_s17, 4  ;;  %s74_s15 = int_to_ptr.vmem [resolvable:$true] %s73_s15  ;;  %s102_s19 = int_to_ptr.vmem [resolvable:$true] %s101_s19 }
  0x59   :  { %s1585_s20 = scalar_lea.hbm %s2047_s4, 2048 }
  0x5a   :  { %p1586_p12 = scmp.ne.s32.totalorder %s2047_s4, %s1585_s20  ;;  %p1589_p13 = scmp.lt.u32.totalorder %s1585_s20, %s2047_s4 }
  0x5c   :  { %p1591_p0 = pnand %p1589_p13, %p1586_p12 }
  0x5e   :  { %1594 = shalt.err (!%p1591_p0)
}
  0x5f   :  { %s1595_s2 = scalar_lea.vmem %s74_s15, 2048  ;;  %p1600_p2 = scmp.lt.s32.totalorder %s74_s15, %s74_s15 }
  0x60   :  { %p1596_p1 = scmp.ne.s32.totalorder %s74_s15, %s1595_s2  ;;  %p1601_p3 = scmp.lt.s32.totalorder %s1595_s2, %s1595_s2 }
  0x62   :  { %p1602_p4 = por %p1601_p3, %p1600_p2 }
  0x64   :  { %p1603_p5 = pnand %p1602_p4, %p1596_p1 }
  0x66   :  { %1606 = shalt.err (!%p1603_p5)
}
  0x67   :  { %79 = dma.hbm_to_vmem [thread:$0]  %s2047_s4, 2048, %s74_s15, [#allocation9], %s1710_s22, %s1710_s22, %s1711_s27  }
  0x68   :  { %s1607_s13 = scalar_lea.hbm %s2051_s8, 6144 }
  0x69   :  { %p1608_p6 = scmp.ne.s32.totalorder %s2051_s8, %s1607_s13  ;;  %p1611_p7 = scmp.lt.u32.totalorder %s1607_s13, %s2051_s8 }
  0x6b   :  { %p1613_p8 = pnand %p1611_p7, %p1608_p6 }
  0x6d   :  { %1616 = shalt.err (!%p1613_p8)
}
  0x6e   :  { %s1617_s6 = scalar_lea.vmem %s102_s19, 6144  ;;  %p1622_p10 = scmp.lt.s32.totalorder %s102_s19, %s102_s19 }
  0x6f   :  { %p1618_p9 = scmp.ne.s32.totalorder %s102_s19, %s1617_s6  ;;  %p1623_p11 = scmp.lt.s32.totalorder %s1617_s6, %s1617_s6 }
  0x71   :  { %p1624_p12 = por %p1623_p11, %p1622_p10 }
  0x73   :  { %p1625_p13 = pnand %p1624_p12, %p1618_p9 }
  0x75   :  { %1628 = shalt.err (!%p1625_p13)
}
  0x76   :  { %107 = dma.hbm_to_vmem [thread:$0]  %s2051_s8, 6144, %s102_s19, [#allocation12], %s1712_s3, %s1712_s3, %s1713_s16  }
  0x77   :  { %1695 = dma.done.wait [#allocation3], 128  }
  0x78   :  { %1696 = vsyncadd [#allocation3], 4294967168 }
  0x79   :  { %1697 = dma.done.wait [#allocation6], 1152  }
  0x7a   :  { %1698 = vsyncadd [#allocation6], 4294966144 }
  0x7b   :  { %1699 = dma.done.wait [#allocation9], 3072  }
  0x7c   :  { %1700 = vsyncadd [#allocation9], 4294964224 }
  0x7d   :  { %1701 = dma.done.wait [#allocation12], 18432  }
  0x7e   :  { %1702 = vsyncadd [#allocation12], 4294948864  ;;  %v1718_v0 = vmov 0.0|0.0   ;;  %vm1719_vm0 = vmmov 0   ;;  %v1720_v1 = vmov 0.0   ;;  %v149_v2 = vld [vmem:[#allocation10] sm:$0xff]  ;;  %v240_v29 = vlaneseq }
  0x7f   :  { %1244 = vmatprep.subr.bf16.mxu0 %v1718_v0  ;;  %1206 = vmatprep.mubr.msk.f32.mxu0 %vm1719_vm0, %v1720_v1  ;;  %v150_v3 = vld [vmem:[#allocation10 + $0x8] sm:$0xff]  ;;  %v151_v4 = vld [vmem:[#allocation10 + $0x10] sm:$0xff]  ;;  %v152_v6 = vld [vmem:[#allocation10 + $0x18] sm:$0xff]  ;;  %v1721_v27 = vmov 1966171168   ;;  %vm415_vm1 = vcmask 1041409  }
  0x80   :  { %v1245_v5 = vpack.c.bf16 %v150_v3, %v149_v2  ;;  %v1248_v7 = vpack.c.bf16 %v152_v6, %v151_v4  ;;  %v153_v8 = vld [vmem:[#allocation10 + $0x20] sm:$0xff]  ;;  %v154_v9 = vld [vmem:[#allocation10 + $0x28] sm:$0xff]  ;;  %v155_v11 = vld [vmem:[#allocation10 + $0x30] sm:$0xff]  ;;  %v238_v28 = vunpack.c.l.s4 %v1721_v27  ;;  %v1900_v31 = vshrl.u32 %v240_v29, 7  ;;  %s1723_s19 = smov [#allocation14]   ;;  %s1724_s20 = smov [#allocation17]  }
  0x81   :  { %v1251_v10 = vpack.c.bf16 %v154_v9, %v153_v8  ;;  %v156_v12 = vld [vmem:[#allocation10 + $0x38] sm:$0xff]  ;;  %v157_v14 = vld [vmem:[#allocation10 + $0x40] sm:$0xff]  ;;  %v158_v15 = vld [vmem:[#allocation10 + $0x48] sm:$0xff]  ;;  %vm417_vm2 = vcmask 1042434   ;;  %vm419_vm3 = vcmask 1043459   ;;  %vm421_vm4 = vcmask 1044484  }
  0x82   :  { %1246 = vmatpush3.bf16.msra.mxu0 %v1245_v5  ;;  %v1254_v13 = vpack.c.bf16 %v156_v12, %v155_v11  ;;  %v1257_v16 = vpack.c.bf16 %v158_v15, %v157_v14  ;;  %v159_v17 = vld [vmem:[#allocation10 + $0x50] sm:$0xff]  ;;  %v160_v18 = vld [vmem:[#allocation10 + $0x58] sm:$0xff]  ;;  %v161_v20 = vld [vmem:[#allocation10 + $0x60] sm:$0xff]  ;;  %v239_v30 = vunpack.c.0.s8 %v238_v28  ;;  %v1904_v37 = vsub.s32 0, %v1900_v31  ;;  %s1063_s18 = sshll.u32 %s1723_s19, 4  ;;  %s1083_s21 = sshll.u32 %s1724_s20, 4  ;;  %s1993_s18 = int_to_ptr.vmem [resolvable:$true] %s1063_s18  ;;  %s1995_s21 = int_to_ptr.vmem [resolvable:$true] %s1083_s21 }
  0x83   :  { %1247 = vmatprep.subr.bf16.mxu0 %v1718_v0  ;;  %v1260_v19 = vpack.c.bf16 %v160_v18, %v159_v17  ;;  %v162_v21 = vld [vmem:[#allocation10 + $0x68] sm:$0xff]  ;;  %v163_v23 = vld [vmem:[#allocation10 + $0x70] sm:$0xff]  ;;  %v164_v24 = vld [vmem:[#allocation10 + $0x78] sm:$0xff]  ;;  %v373_v28 = vand.u32 127, %v240_v29  ;;  %vm423_vm5 = vcmask 1045509   ;;  %vm425_vm6 = vcmask 1046534  }
  0x84   :  { %v1263_v22 = vpack.c.bf16 %v162_v21, %v161_v20  ;;  %v1266_v25 = vpack.c.bf16 %v164_v24, %v163_v23  ;;  %v132_v26 = vld [vmem:[#allocation5] sm:$0xff]  ;;  %v242_v32 = vsub.s32 %v239_v30, %v1900_v31  ;;  %v141_v41 = vld [vmem:[#allocation8] sm:$0xff]  ;;  %v142_v47 = vld [vmem:[#allocation8 + $0x8] sm:$0xff]  ;;  %vm427_vm7 = vcmask 1047559  }
  0x85   :  { %v143_v48 = vld [vmem:[#allocation8 + $0x10] sm:$0xff]  ;;  %v144_v52 = vld [vmem:[#allocation8 + $0x18] sm:$0xff]  ;;  %v145_v57 = vld [vmem:[#allocation8 + $0x20] sm:$0xff]  ;;  %vm374_vm8 = vcmp.lt.s32.totalorder %v373_v28, 8  ;;  %vm431_vm9 = vcmask 64512  }
  0x86   :  { %1249 = vmatpush3.bf16.msra.mxu0 %v1248_v7  ;;  %v146_v2 = vld [vmem:[#allocation8 + $0x28] sm:$0xff]  ;;  %v147_v5 = vld [vmem:[#allocation8 + $0x30] sm:$0xff]  ;;  %v148_v9 = vld [vmem:[#allocation8 + $0x38] sm:$0xff] }
  0x87   :  { %1250 = vmatprep.subr.bf16.mxu0 %v1718_v0 }
  0x8a   :  { %1252 = vmatpush3.bf16.msra.mxu0 %v1251_v10  ;;  %v1102_v10 = vld [vmem:[%s2048_s5] ss:$0 sm:$0xff] }
  0x8b   :  { %1253 = vmatprep.subr.bf16.mxu0 %v1718_v0 }
  0x8e   :  { %1255 = vmatpush3.bf16.msra.mxu0 %v1254_v13 }
  0x8f   :  { %1256 = vmatprep.subr.bf16.mxu0 %v1718_v0 }
  0x92   :  { %1258 = vmatpush3.bf16.msra.mxu0 %v1257_v16 }
  0x93   :  { %1259 = vmatprep.subr.bf16.mxu0 %v1718_v0 }
  0x96   :  { %1261 = vmatpush3.bf16.msra.mxu0 %v1260_v19 }
  0x97   :  { %1262 = vmatprep.subr.bf16.mxu0 %v1718_v0 }
  0x9a   :  { %1264 = vmatpush3.bf16.msra.mxu0 %v1263_v22 }
  0x9b   :  { %1265 = vmatprep.subr.bf16.mxu0 %v1718_v0 }
  0x9e   :  { %1267 = vmatpush3.bf16.msra.mxu0 %v1266_v25 }
  0xa1   :  { %1207 = vmatmul.mubr.f32.vlgmr.msra.gmra.mrb[0].mxu0 %v132_v26 }
 0x174   :  { %v231_v33 = vpop.f32.mrb[0].mxu0 }
 0x175   :  { %v236_v34 = vcombine.high %v231_v33, %v231_v33  ;;  %v243_v35 = vrot.slane %v231_v33, %v242_v32  ;;  %v1208_v36 = vpop.f32.mrb[1].mxu0 }
 0x177   :  { %v250_v38 = vrot.slane %v236_v34, %v242_v32  ;;  %v251_v39 = vcombine.high %v243_v35, %v243_v35  ;;  %v259_v40 = vrot.slane %v243_v35, %v242_v32 }
 0x179   :  { %v252_v42 = vcombine.high %v250_v38, %v250_v38  ;;  %v266_v43 = vrot.slane %v250_v38, %v242_v32  ;;  %v273_v44 = vrot.slane %v251_v39, %v242_v32  ;;  %v281_v45 = vcombine.high %v259_v40, %v259_v40 }
 0x17a   :  { %v288_v46 = vrot.slane %v259_v40, %v1904_v37 }
 0x17b   :  { %v280_v49 = vrot.slane %v252_v42, %v242_v32  ;;  %v283_v50 = vcombine.high %v273_v44, %v273_v44  ;;  %v292_v51 = vrot.slane %v273_v44, %v1904_v37  ;;  %v282_v53 = vcombine.high %v266_v43, %v266_v43 }
 0x17c   :  { %v296_v54 = vrot.slane %v281_v45, %v1904_v37  ;;  %v304_v55 = vrot.slane %v266_v43, %v1904_v37  ;;  %v325_v56 = vadd.f32 %v288_v46, %v141_v41  ;;  %v385_v32 = vsub.s32 %v373_v28, %v1900_v31  ;;  %v599_v28 = vld [vmem:[#allocation11 + $0xd8] sm:$0xff] }
 0x17d   :  { %v300_v58 = vrot.slane %v283_v50, %v1904_v37  ;;  %v326_v59 = vadd.f32 %v292_v51, %v142_v47  ;;  %v284_v61 = vcombine.high %v280_v49, %v280_v49  ;;  %v308_v62 = vrot.slane %v280_v49, %v1904_v37 }
 0x17e   :  { %v327_v60 = vadd.f32 %v296_v54, %v143_v48  ;;  %1444 = vtanh.f32 %v325_v56  ;;  %v312_v3 = vrot.slane %v282_v53, %v1904_v37  ;;  %v329_v4 = vadd.f32 %v304_v55, %v145_v57 }
 0x17f   :  { %v328_v63 = vadd.f32 %v300_v58, %v144_v52  ;;  %1446 = vtanh.f32 %v326_v59  ;;  %v316_v6 = vrot.slane %v284_v61, %v1904_v37  ;;  %v330_v7 = vadd.f32 %v308_v62, %v146_v2  ;;  %v573_v62 = vld [vmem:[#allocation11 + $0x8] sm:$0xff]  ;;  %v572_v2 = vld [vmem:[#allocation11] sm:$0xff] }
 0x180   :  { %1448 = vtanh.f32 %v327_v60  ;;  %v331_v8 = vadd.f32 %v312_v3, %v147_v5  ;;  %v579_v5 = vld [vmem:[#allocation11 + $0x38] sm:$0xff] }
 0x181   :  { %1450 = vtanh.f32 %v328_v63  ;;  %v332_v11 = vadd.f32 %v316_v6, %v148_v9  ;;  %v576_v63 = vld [vmem:[#allocation11 + $0x20] sm:$0xff]  ;;  %v582_v6 = vld [vmem:[#allocation11 + $0x50] sm:$0xff] }
 0x182   :  { %1452 = vtanh.f32 %v329_v4  ;;  %v1268_v3 = vpack.c.bf16 %v576_v63, %v573_v62  ;;  %v575_v4 = vld [vmem:[#allocation11 + $0x18] sm:$0xff]  ;;  %v578_v9 = vld [vmem:[#allocation11 + $0x30] sm:$0xff]  ;;  %v629_v62 = vld [vmem:[#allocation11 + $0x1c8] sm:$0xff] }
 0x183   :  { %1454 = vtanh.f32 %v330_v7  ;;  %v1270_v7 = vpack.c.bf16 %v575_v4, %v572_v2  ;;  %v633_v2 = vld [vmem:[#allocation11 + $0x1e8] sm:$0xff]  ;;  %v1932_v4 = vsub.s32 1, %v1900_v31 }
 0x184   :  { %1456 = vtanh.f32 %v331_v8  ;;  %v1272_v8 = vpack.c.bf16 %v582_v6, %v579_v5  ;;  %1269 = vmatprep.subr.bf16.mxu1 %v1268_v3  ;;  %v636_v3 = vld [vmem:[#allocation11 + $0x200] sm:$0xff] }
 0x185   :  { %1458 = vtanh.f32 %v332_v11  ;;  %v585_v11 = vld [vmem:[#allocation11 + $0x68] sm:$0xff]  ;;  %1271 = vmatpush1.bf16.msra.mxu1 %v1270_v7  ;;  %v1308_v5 = vpack.c.bf16 %v636_v3, %v633_v2  ;;  %v632_v6 = vld [vmem:[#allocation11 + $0x1e0] sm:$0xff]  ;;  %v635_v7 = vld [vmem:[#allocation11 + $0x1f8] sm:$0xff] }
 0x186   :  { %1273 = vmatprep.subr.bf16.mxu1 %v1272_v8  ;;  %v580_v3 = vld [vmem:[#allocation11 + $0x40] sm:$0xff] }
 0x188   :  { %v1445_v12 = vpop.eup %1444 }
 0x189   :  { %v348_v13 = vmul.f32 %v1445_v12, %v1102_v10  ;;  %v1447_v14 = vpop.eup %1446  ;;  %v588_v12 = vld [vmem:[#allocation11 + $0x80] sm:$0xff] }
 0x18a   :  { %v1449_v15 = vpop.eup %1448  ;;  %v349_v18 = vmul.f32 %v1447_v14, %v1102_v10  ;;  %v1276_v14 = vpack.c.bf16 %v588_v12, %v585_v11  ;;  %v639_v11 = vld [vmem:[#allocation11 + $0x218] sm:$0xff]  ;;  %v642_v12 = vld [vmem:[#allocation11 + $0x230] sm:$0xff] }
 0x18b   :  { %356 = vadd.xlane.f32.xlu0 %v348_v13  ;;  %v350_v16 = vmul.f32 %v1449_v15, %v1102_v10  ;;  %v1451_v17 = vpop.eup %1450  ;;  %v584_v15 = vld [vmem:[#allocation11 + $0x60] sm:$0xff] }
 0x18c   :  { %v1453_v19 = vpop.eup %1452  ;;  %v351_v20 = vmul.f32 %v1451_v17, %v1102_v10  ;;  %v591_v17 = vld [vmem:[#allocation11 + $0x98] sm:$0xff] }
 0x18d   :  { %360 = vadd.xlane.f32.xlu1 %v350_v16  ;;  %v1455_v21 = vpop.eup %1454  ;;  %v352_v22 = vmul.f32 %v1453_v19, %v1102_v10  ;;  %v587_v16 = vld [vmem:[#allocation11 + $0x78] sm:$0xff] }
 0x18e   :  { %v1457_v23 = vpop.eup %1456  ;;  %v353_v24 = vmul.f32 %v1455_v21, %v1102_v10  ;;  %v1278_v19 = vpack.c.bf16 %v587_v16, %v584_v15  ;;  %v590_v21 = vld [vmem:[#allocation11 + $0x90] sm:$0xff]  ;;  %v1944_v15 = vsub.s32 2, %v1900_v31  ;;  %v474_v16 = vsub.s32 4, %v1900_v31 }
 0x18f   :  { %358 = vadd.xlane.f32.xlu0 %v349_v18  ;;  %v1459_v25 = vpop.eup %1458  ;;  %v354_v26 = vmul.f32 %v1457_v23, %v1102_v10  ;;  %v594_v18 = vld [vmem:[#allocation11 + $0xb0] sm:$0xff]  ;;  %v597_v23 = vld [vmem:[#allocation11 + $0xc8] sm:$0xff] }
 0x190   :  { %v355_v27 = vmul.f32 %v1459_v25, %v1102_v10  ;;  %v581_v10 = vld [vmem:[#allocation11 + $0x48] sm:$0xff] }
 0x191   :  { %362 = vadd.xlane.f32.xlu1 %v351_v20  ;;  %v1274_v13 = vpack.c.bf16 %v581_v10, %v578_v9  ;;  %v1280_v20 = vpack.c.bf16 %v594_v18, %v591_v17  ;;  %v1310_v9 = vpack.c.bf16 %v635_v7, %v632_v6  ;;  %v641_v17 = vld [vmem:[#allocation11 + $0x228] sm:$0xff]  ;;  %v1312_v18 = vpack.c.bf16 %v642_v12, %v639_v11  ;;  %v1958_v11 = vld [vmem:[#allocation2] sm:$0xff] }
 0x192   :  { %v827_v7 = vld [vmem:[#allocation13 + $0x8] sm:$0xff]  ;;  %1056 = vst [vmem:[#allocation14 + $0x10] sm:$0xff] %v1958_v11 }
 0x193   :  { %364 = vadd.xlane.f32.xlu0 %v352_v22  ;;  %1275 = vmatpush1.bf16.msra.mxu1 %v1274_v13  ;;  %v593_v22 = vld [vmem:[#allocation11 + $0xa8] sm:$0xff] }
 0x194   :  { %1277 = vmatprep.subr.bf16.mxu1 %v1276_v14  ;;  %v1282_v25 = vpack.c.bf16 %v593_v22, %v590_v21  ;;  %v645_v21 = vld [vmem:[#allocation11 + $0x248] sm:$0xff]  ;;  %v648_v22 = vld [vmem:[#allocation11 + $0x260] sm:$0xff] }
 0x195   :  { %366 = vadd.xlane.f32.xlu1 %v353_v24  ;;  %v600_v24 = vld [vmem:[#allocation11 + $0xe0] sm:$0xff]  ;;  %v637_v12 = vld [vmem:[#allocation11 + $0x208] sm:$0xff] }
 0x197   :  { %368 = vadd.xlane.f32.xlu0 %v354_v26  ;;  %1279 = vmatpush1.bf16.msra.mxu1 %v1278_v19  ;;  %v1284_v26 = vpack.c.bf16 %v600_v24, %v597_v23 }
 0x198   :  { %1281 = vmatprep.subr.bf16.mxu1 %v1280_v20  ;;  %v467_v20 = vsub.s32 3, %v1900_v31 }
 0x199   :  { %370 = vadd.xlane.f32.xlu1 %v355_v27  ;;  %v596_v27 = vld [vmem:[#allocation11 + $0xc0] sm:$0xff] }
 0x19b   :  { %1283 = vmatpush1.bf16.msra.mxu1 %v1282_v25  ;;  %v488_v25 = vsub.s32 6, %v1900_v31 }
 0x19c   :  { %1285 = vmatprep.subr.bf16.mxu1 %v1284_v26  ;;  %v1316_v26 = vpack.c.bf16 %v648_v22, %v645_v21  ;;  %v595_v21 = vld [vmem:[#allocation11 + $0xb8] sm:$0xff] }
 0x218   :  { %v357_v30 = vpop.xlane.xlu0 %356 }
 0x219   :  { %v386_v35 = vrot.slane %v357_v30, %v385_v32  ;;  %v603_v30 = vld [vmem:[#allocation11 + $0xf8] sm:$0xff] }
 0x21a   :  { %v361_v33 = vpop.xlane.xlu1 %360 }
 0x21b   :  { %v394_v38 = vrot.slane %v361_v33, %v385_v32  ;;  %v1286_v33 = vpack.c.bf16 %v599_v28, %v596_v27  ;;  %v644_v27 = vld [vmem:[#allocation11 + $0x240] sm:$0xff]  ;;  %v647_v28 = vld [vmem:[#allocation11 + $0x258] sm:$0xff] }
 0x21c   :  { %v359_v34 = vpop.xlane.xlu0 %358 }
 0x21d   :  { %v390_v36 = vrot.slane %v359_v34, %v385_v32  ;;  %1287 = vmatpush1.bf16.msra.mxu1 %v1286_v33  ;;  %v654_v33 = vld [vmem:[#allocation11 + $0x290] sm:$0xff] }
 0x21e   :  { %v363_v40 = vpop.xlane.xlu1 %362 }
 0x21f   :  { %v416_v39 = vsel %vm415_vm1, %v390_v36, %v386_v35  ;;  %v398_v42 = vrot.slane %v363_v40, %v385_v32  ;;  %v602_v35 = vld [vmem:[#allocation11 + $0xf0] sm:$0xff]  ;;  %v605_v36 = vld [vmem:[#allocation11 + $0x108] sm:$0xff] }
 0x220   :  { %v418_v41 = vsel %vm417_vm2, %v394_v38, %v416_v39  ;;  %v365_v43 = vpop.xlane.xlu0 %364  ;;  %v609_v38 = vld [vmem:[#allocation11 + $0x128] sm:$0xff]  ;;  %v612_v39 = vld [vmem:[#allocation11 + $0x140] sm:$0xff]  ;;  %v1290_v40 = vpack.c.bf16 %v605_v36, %v602_v35  ;;  %v481_v36 = vsub.s32 5, %v1900_v31 }
 0x221   :  { %v402_v29 = vrot.slane %v365_v43, %v385_v32  ;;  %v420_v44 = vsel %vm419_vm3, %v398_v42, %v418_v41  ;;  %v1292_v41 = vpack.c.bf16 %v612_v39, %v609_v38  ;;  %v608_v42 = vld [vmem:[#allocation11 + $0x120] sm:$0xff]  ;;  %v611_v43 = vld [vmem:[#allocation11 + $0x138] sm:$0xff]  ;;  %v650_v39 = vld [vmem:[#allocation11 + $0x270] sm:$0xff] }
 0x222   :  { %v367_v46 = vpop.xlane.xlu1 %366 }
 0x223   :  { %v422_v45 = vsel %vm421_vm4, %v402_v29, %v420_v44  ;;  %v406_v47 = vrot.slane %v367_v46, %v385_v32  ;;  %v615_v29 = vld [vmem:[#allocation11 + $0x158] sm:$0xff]  ;;  %v618_v44 = vld [vmem:[#allocation11 + $0x170] sm:$0xff] }
 0x224   :  { %v369_v48 = vpop.xlane.xlu0 %368  ;;  %v1296_v46 = vpack.c.bf16 %v618_v44, %v615_v29  ;;  %v495_v44 = vsub.s32 7, %v1900_v31 }
 0x225   :  { %v410_v49 = vrot.slane %v369_v48, %v385_v32  ;;  %v424_v50 = vsel %vm423_vm5, %v406_v47, %v422_v45  ;;  %v1294_v45 = vpack.c.bf16 %v611_v43, %v608_v42  ;;  %v614_v47 = vld [vmem:[#allocation11 + $0x150] sm:$0xff]  ;;  %v617_v48 = vld [vmem:[#allocation11 + $0x168] sm:$0xff]  ;;  %v660_v43 = vld [vmem:[#allocation11 + $0x2c0] sm:$0xff] }
 0x226   :  { %v371_v51 = vpop.xlane.xlu1 %370  ;;  %v657_v42 = vld [vmem:[#allocation11 + $0x2a8] sm:$0xff] }
 0x227   :  { %v426_v52 = vsel %vm425_vm6, %v410_v49, %v424_v50  ;;  %v414_v53 = vrot.slane %v371_v51, %v385_v32  ;;  %v606_v32 = vld [vmem:[#allocation11 + $0x110] sm:$0xff]  ;;  %v621_v49 = vld [vmem:[#allocation11 + $0x188] sm:$0xff]  ;;  %v624_v50 = vld [vmem:[#allocation11 + $0x1a0] sm:$0xff]  ;;  %v1298_v51 = vpack.c.bf16 %v617_v48, %v614_v47 }
 0x228   :  { %v1288_v34 = vpack.c.bf16 %v606_v32, %v603_v30  ;;  %v1318_v30 = vpack.c.bf16 %v647_v28, %v644_v27  ;;  %v651_v32 = vld [vmem:[#allocation11 + $0x278] sm:$0xff]  ;;  %v622_v48 = vld [vmem:[#allocation11 + $0x190] sm:$0xff]  ;;  %v601_v27 = vld [vmem:[#allocation11 + $0xe8] sm:$0xff] }
 0x229   :  { %v428_v54 = vsel %vm427_vm7, %v414_v53, %v426_v52  ;;  %v1300_v52 = vpack.c.bf16 %v624_v50, %v621_v49  ;;  %v1320_v38 = vpack.c.bf16 %v654_v33, %v651_v32  ;;  %v659_v47 = vld [vmem:[#allocation11 + $0x2b8] sm:$0xff]  ;;  %v625_v50 = vld [vmem:[#allocation11 + $0x1a8] sm:$0xff] }
 0x22a   :  { %v430_v55 = vsel %vm374_vm8, %v428_v54, -1e+30  ;;  %1289 = vmatprep.subr.bf16.mxu1 %v1288_v34  ;;  %v620_v54 = vld [vmem:[#allocation11 + $0x180] sm:$0xff]  ;;  %v655_v32 = vld [vmem:[#allocation11 + $0x298] sm:$0xff] }
 0x22b   :  { %v432_v56 = vsel %vm431_vm9, %v430_v55, -inf  ;;  %1291 = vmatpush1.bf16.msra.mxu1 %v1290_v40  ;;  %v653_v40 = vld [vmem:[#allocation11 + $0x288] sm:$0xff] }
 0x22c   :  { %433 = vmax.xlane.f32.xlu0 %v432_v56  ;;  %1293 = vmatprep.subr.bf16.mxu1 %v1292_v41  ;;  %v1322_v41 = vpack.c.bf16 %v653_v40, %v650_v39  ;;  %v661_v39 = vld [vmem:[#allocation11 + $0x2c8] sm:$0xff] }
 0x22f   :  { %1295 = vmatpush1.bf16.msra.mxu1 %v1294_v45  ;;  %v1324_v45 = vpack.c.bf16 %v660_v43, %v657_v42  ;;  %v613_v42 = vld [vmem:[#allocation11 + $0x148] sm:$0xff] }
 0x230   :  { %1297 = vmatprep.subr.bf16.mxu1 %v1296_v46  ;;  %v656_v46 = vld [vmem:[#allocation11 + $0x2a0] sm:$0xff] }
 0x231   :  { %v1326_v49 = vpack.c.bf16 %v659_v47, %v656_v46  ;;  %v616_v46 = vld [vmem:[#allocation11 + $0x160] sm:$0xff]  ;;  %v619_v47 = vld [vmem:[#allocation11 + $0x178] sm:$0xff] }
 0x233   :  { %1299 = vmatpush1.bf16.msra.mxu1 %v1298_v51  ;;  %v574_v51 = vld [vmem:[#allocation11 + $0x10] sm:$0xff] }
 0x234   :  { %1301 = vmatprep.subr.bf16.mxu1 %v1300_v52  ;;  %v577_v52 = vld [vmem:[#allocation11 + $0x28] sm:$0xff] }
 0x2b9   :  { %v434_v57 = vpop.xlane.xlu0 %433 }
 0x2ba   :  { %v435_v58 = vsub.f32 %v430_v55, %v434_v57  ;;  %v623_v55 = vld [vmem:[#allocation11 + $0x198] sm:$0xff] }
 0x2bb   :  { %v1302_v56 = vpack.c.bf16 %v623_v55, %v620_v54  ;;  %v627_v57 = vld [vmem:[#allocation11 + $0x1b8] sm:$0xff]  ;;  %v1334_v54 = vpack.c.bf16 %v577_v52, %v574_v51 }
 0x2bc   :  { %v436_v59 = vmul.f32 1.442695, %v435_v58  ;;  %v630_v58 = vld [vmem:[#allocation11 + $0x1d0] sm:$0xff]  ;;  %v663_v55 = vld [vmem:[#allocation11 + $0x2d8] sm:$0xff] }
 0x2bd   :  { %1303 = vmatpush1.bf16.msra.mxu1 %v1302_v56  ;;  %v666_v56 = vld [vmem:[#allocation11 + $0x2f0] sm:$0xff] }
 0x2be   :  { %1460 = vpow2.f32 %v436_v59  ;;  %v1304_v59 = vpack.c.bf16 %v630_v58, %v627_v57  ;;  %v662_v57 = vld [vmem:[#allocation11 + $0x2d0] sm:$0xff]  ;;  %v1328_v31 = vpack.c.bf16 %v666_v56, %v663_v55  ;;  %v137_v56 = vld [vmem:[#allocation7 + $0x20] sm:$0xff] }
 0x2bf   :  { %v135_v55 = vld [vmem:[#allocation7 + $0x10] sm:$0xff] }
 0x2c0   :  { %1305 = vmatprep.subr.bf16.mxu1 %v1304_v59  ;;  %v665_v59 = vld [vmem:[#allocation11 + $0x2e8] sm:$0xff] }
 0x2c8   :  { %v1927_v60 = vpop.eup %1460 }
 0x2c9   :  { %v438_v61 = vsel %vm431_vm9, %v1927_v60, 0.0 }
 0x2ca   :  { %439 = vadd.xlane.f32.xlu1 %v438_v61  ;;  %v626_v61 = vld [vmem:[#allocation11 + $0x1b0] sm:$0xff] }
 0x2cb   :  { %v1306_v63 = vpack.c.bf16 %v629_v62, %v626_v61  ;;  %v628_v61 = vld [vmem:[#allocation11 + $0x1c0] sm:$0xff]  ;;  %v631_v62 = vld [vmem:[#allocation11 + $0x1d8] sm:$0xff] }
 0x2cc   :  { %v1336_v2 = vpack.c.bf16 %v631_v62, %v628_v61 }
 0x2cd   :  { %1307 = vmatpush1.bf16.msra.mxu1 %v1306_v63  ;;  %v1330_v63 = vpack.c.bf16 %v665_v59, %v662_v57 }
 0x2ce   :  { %1309 = vmatprep.subr.bf16.mxu1 %v1308_v5  ;;  %v583_v5 = vld [vmem:[#allocation11 + $0x58] sm:$0xff] }
 0x2cf   :  { %v1338_v6 = vpack.c.bf16 %v583_v5, %v580_v3 }
 0x2d1   :  { %1311 = vmatpush1.bf16.msra.mxu1 %v1310_v9 }
 0x2d2   :  { %1313 = vmatprep.subr.bf16.mxu1 %v1312_v18  ;;  %v643_v18 = vld [vmem:[#allocation11 + $0x238] sm:$0xff] }
 0x357   :  { %v440_v53 = vpop.xlane.xlu1 %439 }
 0x358   :  { %1462 = vrcp.f32 %v440_v53  ;;  %v1332_v53 = vpack.c.bf16 %v625_v50, %v622_v48  ;;  %v1362_v48 = vpack.c.bf16 %v619_v47, %v616_v46  ;;  %v133_v50 = vld [vmem:[#allocation7] sm:$0xff] }
 0x35a   :  { %1333 = vmatprep.subr.bf16.mxu0 %v1332_v53 }
 0x35b   :  { %1335 = vmatpush3.bf16.msra.mxu0 %v1334_v54 }
 0x35c   :  { %1337 = vmatprep.subr.bf16.mxu0 %v1336_v2 }
 0x35f   :  { %1339 = vmatpush3.bf16.msra.mxu0 %v1338_v6 }
 0x362   :  { %v1463_v8 = vpop.eup %1462 }
 0x363   :  { %v1935_v10 = vmul.f32 %v1463_v8, %v1927_v60  ;;  %v638_v60 = vld [vmem:[#allocation11 + $0x210] sm:$0xff]  ;;  %v830_v8 = vld [vmem:[#allocation13 + $0x20] sm:$0xff] }
 0x364   :  { %v1314_v19 = vpack.c.bf16 %v641_v17, %v638_v60  ;;  %v1364_v9 = vpack.c.bf16 %v830_v8, %v827_v7  ;;  %v640_v17 = vld [vmem:[#allocation11 + $0x220] sm:$0xff]  ;;  %v136_v8 = vld [vmem:[#allocation7 + $0x18] sm:$0xff] }
 0x365   :  { %443 = vst.msk [vmem:[#allocation17] sm:$0xff] %vm431_vm9, %v1935_v10  ;;  %v454_v13 = vrot.slane %v1935_v10, %v1932_v4  ;;  %v447_v14 = vrot.slane %v1935_v10, %v1904_v37  ;;  %v461_v23 = vrot.slane %v1935_v10, %v1944_v15  ;;  %v475_v24 = vrot.slane %v1935_v10, %v474_v16  ;;  %v589_v16 = vld [vmem:[#allocation11 + $0x88] sm:$0xff] }
 0x366   :  { %1315 = vmatpush1.bf16.msra.mxu1 %v1314_v19  ;;  %v468_v34 = vrot.slane %v1935_v10, %v467_v20  ;;  %v489_v35 = vrot.slane %v1935_v10, %v488_v25  ;;  %v482_v29 = vrot.slane %v1935_v10, %v481_v36  ;;  %v496_v58 = vrot.slane %v1935_v10, %v495_v44  ;;  %v634_v10 = vld [vmem:[#allocation11 + $0x1f0] sm:$0xff]  ;;  %v592_v20 = vld [vmem:[#allocation11 + $0xa0] sm:$0xff]  ;;  %v667_v44 = vld [vmem:[#allocation11 + $0x2f8] sm:$0xff] }
 0x367   :  { %456 = vbcast.lane.b32.xlu1 %v454_v13, 256  ;;  %449 = vbcast.lane.b32.xlu0 %v447_v14, 256  ;;  %v1340_v13 = vpack.c.bf16 %v637_v12, %v634_v10  ;;  %v586_v14 = vld [vmem:[#allocation11 + $0x70] sm:$0xff]  ;;  %v1344_v19 = vpack.c.bf16 %v643_v18, %v640_v17  ;;  %v1346_v22 = vpack.c.bf16 %v595_v21, %v592_v20  ;;  %v138_v20 = vld [vmem:[#allocation7 + $0x28] sm:$0xff] }
 0x368   :  { %1317 = vmatprep.subr.bf16.mxu1 %v1316_v26  ;;  %v1342_v60 = vpack.c.bf16 %v589_v16, %v586_v14  ;;  %v598_v26 = vld [vmem:[#allocation11 + $0xd0] sm:$0xff] }
 0x369   :  { %1341 = vmatprep.subr.bf16.mxu0 %v1340_v13  ;;  %v1350_v28 = vpack.c.bf16 %v601_v27, %v598_v26 }
 0x36a   :  { %1319 = vmatpush1.bf16.msra.mxu1 %v1318_v30  ;;  %1343 = vmatpush3.bf16.msra.mxu0 %v1342_v60  ;;  %v652_v30 = vld [vmem:[#allocation11 + $0x280] sm:$0xff] }
 0x36b   :  { %463 = vbcast.lane.b32.xlu1 %v461_v23, 256  ;;  %477 = vbcast.lane.b32.xlu0 %v475_v24, 256  ;;  %v646_v23 = vld [vmem:[#allocation11 + $0x250] sm:$0xff]  ;;  %v649_v24 = vld [vmem:[#allocation11 + $0x268] sm:$0xff]  ;;  %v1352_v33 = vpack.c.bf16 %v655_v32, %v652_v30 }
 0x36c   :  { %1321 = vmatprep.subr.bf16.mxu1 %v1320_v38  ;;  %1345 = vmatprep.subr.bf16.mxu0 %v1344_v19  ;;  %v1348_v25 = vpack.c.bf16 %v649_v24, %v646_v23  ;;  %v658_v38 = vld [vmem:[#allocation11 + $0x2b0] sm:$0xff] }
 0x36d   :  { %v1356_v40 = vpack.c.bf16 %v661_v39, %v658_v38 }
 0x36e   :  { %1323 = vmatpush1.bf16.msra.mxu1 %v1322_v41  ;;  %1347 = vmatpush3.bf16.msra.mxu0 %v1346_v22  ;;  %v610_v41 = vld [vmem:[#allocation11 + $0x130] sm:$0xff] }
 0x36f   :  { %470 = vbcast.lane.b32.xlu1 %v468_v34, 256  ;;  %491 = vbcast.lane.b32.xlu0 %v489_v35, 256  ;;  %v604_v34 = vld [vmem:[#allocation11 + $0x100] sm:$0xff]  ;;  %v607_v35 = vld [vmem:[#allocation11 + $0x118] sm:$0xff]  ;;  %v1358_v43 = vpack.c.bf16 %v613_v42, %v610_v41 }
 0x370   :  { %1325 = vmatprep.subr.bf16.mxu1 %v1324_v45  ;;  %1349 = vmatprep.subr.bf16.mxu0 %v1348_v25  ;;  %v1354_v36 = vpack.c.bf16 %v607_v35, %v604_v34 }
 0x372   :  { %1327 = vmatpush1.bf16.msra.mxu1 %v1326_v49  ;;  %1351 = vmatpush3.bf16.msra.mxu0 %v1350_v28  ;;  %v134_v49 = vld [vmem:[#allocation7 + $0x8] sm:$0xff] }
 0x373   :  { %484 = vbcast.lane.b32.xlu1 %v482_v29, 256  ;;  %1329 = vmatprep.subr.bf16.mxu1 %v1328_v31  ;;  %v664_v29 = vld [vmem:[#allocation11 + $0x2e0] sm:$0xff] }
 0x374   :  { %1353 = vmatprep.subr.bf16.mxu0 %v1352_v33  ;;  %v1360_v45 = vpack.c.bf16 %v667_v44, %v664_v29  ;;  %v140_v33 = vld [vmem:[#allocation7 + $0x38] sm:$0xff] }
 0x376   :  { %1331 = vmatpush1.bf16.msra.mxu1 %v1330_v63  ;;  %1355 = vmatpush3.bf16.msra.mxu0 %v1354_v36 }
 0x377   :  { %498 = vbcast.lane.b32.xlu1 %v496_v58, 256  ;;  %1365 = vmatprep.subr.bf16.mxu1 %v1364_v9  ;;  %v139_v9 = vld [vmem:[#allocation7 + $0x30] sm:$0xff] }
 0x378   :  { %1357 = vmatprep.subr.bf16.mxu0 %v1356_v40 }
 0x37a   :  { %1359 = vmatpush3.bf16.msra.mxu0 %v1358_v43 }
 0x37b   :  { %1361 = vmatprep.subr.bf16.mxu0 %v1360_v45 }
 0x37e   :  { %1363 = vmatpush3.bf16.msra.mxu0 %v1362_v48 }
 0x37f   :  { %1396 = vmatprep.subr.bf16.mxu0 %v1718_v0 }
 0x3d9   :  { %v457_v51 = vpop.permute.xlu1 %456  ;;  %v450_v52 = vpop.permute.xlu0 %449 }
 0x3da   :  { %v501_v53 = vmul.f32 %v457_v51, %v134_v49  ;;  %v500_v54 = vmul.f32 %v450_v52, %v133_v50 }
 0x3dc   :  { %v514_v57 = vrot.slane %v501_v53, 4  ;;  %v508_v58 = vrot.slane %v500_v54, 4 }
 0x3dd   :  { %v464_v31 = vpop.permute.xlu1 %463  ;;  %v478_v59 = vpop.permute.xlu0 %477 }
 0x3de   :  { %v515_v61 = vadd.f32 %v514_v57, %v501_v53  ;;  %v509_v62 = vadd.f32 %v508_v58, %v500_v54  ;;  %v502_v63 = vmul.f32 %v464_v31, %v135_v55  ;;  %v504_v2 = vmul.f32 %v478_v59, %v137_v56 }
 0x3e0   :  { %v516_v3 = vrot.slane %v515_v61, 2  ;;  %v510_v5 = vrot.slane %v509_v62, 2  ;;  %v520_v6 = vrot.slane %v502_v63, 4  ;;  %v532_v7 = vrot.slane %v504_v2, 4 }
 0x3e1   :  { %v471_v10 = vpop.permute.xlu1 %470  ;;  %v492_v12 = vpop.permute.xlu0 %491 }
 0x3e2   :  { %v517_v13 = vadd.f32 %v516_v3, %v515_v61  ;;  %v521_v14 = vadd.f32 %v520_v6, %v502_v63  ;;  %v533_v16 = vadd.f32 %v532_v7, %v504_v2  ;;  %v511_v60 = vadd.f32 %v510_v5, %v509_v62  ;;  %v826_v63 = vld [vmem:[#allocation13] sm:$0xff]  ;;  %v829_v5 = vld [vmem:[#allocation13 + $0x18] sm:$0xff]  ;;  %v828_v6 = vld [vmem:[#allocation13 + $0x10] sm:$0xff] }
 0x3e3   :  { %v503_v17 = vmul.f32 %v471_v10, %v136_v8  ;;  %v506_v18 = vmul.f32 %v492_v12, %v139_v9  ;;  %v831_v7 = vld [vmem:[#allocation13 + $0x28] sm:$0xff]  ;;  %v833_v10 = vld [vmem:[#allocation13 + $0x38] sm:$0xff]  ;;  %v836_v12 = vld [vmem:[#allocation13 + $0x50] sm:$0xff] }
 0x3e4   :  { %v522_v19 = vrot.slane %v521_v14, 2  ;;  %v518_v24 = vrot.slane %v517_v13, 1  ;;  %v534_v26 = vrot.slane %v533_v16, 2  ;;  %v512_v27 = vrot.slane %v511_v60, 1 }
 0x3e5   :  { %v526_v21 = vrot.slane %v503_v17, 4  ;;  %v544_v22 = vrot.slane %v506_v18, 4  ;;  %v485_v23 = vpop.permute.xlu1 %484 }
 0x3e6   :  { %v523_v25 = vadd.f32 %v522_v19, %v521_v14  ;;  %v505_v32 = vmul.f32 %v485_v23, %v138_v20  ;;  %v535_v40 = vadd.f32 %v534_v26, %v533_v16  ;;  %v519_v42 = vadd.f32 %v518_v24, %v517_v13  ;;  %v835_v20 = vld [vmem:[#allocation13 + $0x48] sm:$0xff]  ;;  %v842_v24 = vld [vmem:[#allocation13 + $0x80] sm:$0xff] }
 0x3e7   :  { %v527_v28 = vadd.f32 %v526_v21, %v503_v17  ;;  %v545_v30 = vadd.f32 %v544_v22, %v506_v18  ;;  %v513_v43 = vadd.f32 %v512_v27, %v511_v60  ;;  %v1366_v16 = vpack.c.bf16 %v829_v5, %v826_v63  ;;  %v832_v60 = vld [vmem:[#allocation13 + $0x30] sm:$0xff]  ;;  %v834_v21 = vld [vmem:[#allocation13 + $0x40] sm:$0xff]  ;;  %v837_v22 = vld [vmem:[#allocation13 + $0x58] sm:$0xff] }
 0x3e8   :  { %v524_v34 = vrot.slane %v523_v25, 1  ;;  %v538_v38 = vrot.slane %v505_v32, 4  ;;  %v536_v50 = vrot.slane %v535_v40, 1  ;;  %v1397_v17 = vpack.c.bf16 %v831_v7, %v828_v6  ;;  %v839_v23 = vld [vmem:[#allocation13 + $0x68] sm:$0xff]  ;;  %v838_v26 = vld [vmem:[#allocation13 + $0x60] sm:$0xff]  ;;  %v864_v5 = vld [vmem:[#allocation13 + $0x130] sm:$0xff] }
 0x3e9   :  { %v528_v35 = vrot.slane %v527_v28, 2  ;;  %v546_v36 = vrot.slane %v545_v30, 2  ;;  %v499_v39 = vpop.permute.xlu1 %498  ;;  %v564_v52 = vsel %vm415_vm1, %v519_v42, %v513_v43  ;;  %v1368_v19 = vpack.c.bf16 %v836_v12, %v833_v10  ;;  %v849_v42 = vld [vmem:[#allocation13 + $0xb8] sm:$0xff]  ;;  %v851_v43 = vld [vmem:[#allocation13 + $0xc8] sm:$0xff]  ;;  %v868_v10 = vld [vmem:[#allocation13 + $0x150] sm:$0xff] }
 0x3ea   :  { %v507_v41 = vmul.f32 %v499_v39, %v140_v33  ;;  %v539_v44 = vadd.f32 %v538_v38, %v505_v32  ;;  %v525_v45 = vadd.f32 %v524_v34, %v523_v25  ;;  %v537_v59 = vadd.f32 %v536_v50, %v535_v40  ;;  %v840_v32 = vld [vmem:[#allocation13 + $0x70] sm:$0xff]  ;;  %v843_v33 = vld [vmem:[#allocation13 + $0x88] sm:$0xff]  ;;  %v845_v34 = vld [vmem:[#allocation13 + $0x98] sm:$0xff] }
 0x3eb   :  { %v529_v29 = vadd.f32 %v528_v35, %v527_v28  ;;  %v547_v48 = vadd.f32 %v546_v36, %v545_v30  ;;  %v1370_v25 = vpack.c.bf16 %v835_v20, %v832_v60  ;;  %v1400_v27 = vpack.c.bf16 %v837_v22, %v834_v21  ;;  %v841_v30 = vld [vmem:[#allocation13 + $0x78] sm:$0xff]  ;;  %v848_v35 = vld [vmem:[#allocation13 + $0xb0] sm:$0xff]  ;;  %v847_v40 = vld [vmem:[#allocation13 + $0xa8] sm:$0xff] }
 0x3ec   :  { %v550_v46 = vrot.slane %v507_v41, 4  ;;  %v540_v49 = vrot.slane %v539_v44, 2  ;;  %v565_v55 = vsel %vm417_vm2, %v525_v45, %v564_v52  ;;  %v1372_v28 = vpack.c.bf16 %v842_v24, %v839_v23  ;;  %v844_v36 = vld [vmem:[#allocation13 + $0x90] sm:$0xff]  ;;  %v850_v45 = vld [vmem:[#allocation13 + $0xc0] sm:$0xff]  ;;  %v857_v50 = vld [vmem:[#allocation13 + $0xf8] sm:$0xff] }
 0x3ed   :  { %v530_v47 = vrot.slane %v529_v29, 1  ;;  %v548_v57 = vrot.slane %v547_v48, 1  ;;  %v1403_v38 = vpack.c.bf16 %v843_v33, %v840_v32  ;;  %v1376_v39 = vpack.c.bf16 %v848_v35, %v845_v34  ;;  %v867_v6 = vld [vmem:[#allocation13 + $0x148] sm:$0xff]  ;;  %v869_v7 = vld [vmem:[#allocation13 + $0x158] sm:$0xff]  ;;  %v668_v23 = vld [vmem:[%s2050_s7] sm:$0x7] }
 0x3ee   :  { %v551_v51 = vadd.f32 %v550_v46, %v507_v41  ;;  %v541_v54 = vadd.f32 %v540_v49, %v539_v44  ;;  %v846_v41 = vld [vmem:[#allocation13 + $0xa0] sm:$0xff]  ;;  %v1378_v44 = vpack.c.bf16 %v847_v40, %v844_v36  ;;  %v855_v49 = vld [vmem:[#allocation13 + $0xe8] sm:$0xff]  ;;  %v1415_v12 = vpack.c.bf16 %v867_v6, %v864_v5  ;;  %v873_v60 = vld [vmem:[#allocation13 + $0x178] sm:$0xff]  ;;  %s1722_s7 = smov [#allocation15]  }
 0x3ef   :  { %v531_v53 = vadd.f32 %v530_v47, %v529_v29  ;;  %v549_v8 = vadd.f32 %v548_v57, %v547_v48  ;;  %v854_v29 = vld [vmem:[#allocation13 + $0xe0] sm:$0xff]  ;;  %v1406_v46 = vpack.c.bf16 %v849_v42, %v846_v41  ;;  %v853_v47 = vld [vmem:[#allocation13 + $0xd8] sm:$0xff]  ;;  %v852_v48 = vld [vmem:[#allocation13 + $0xd0] sm:$0xff] }
 0x3f0   :  { %v552_v56 = vrot.slane %v551_v51, 2  ;;  %v542_v58 = vrot.slane %v541_v54, 1  ;;  %v1382_v52 = vpack.c.bf16 %v853_v47, %v850_v45  ;;  %v858_v57 = vld [vmem:[#allocation13 + $0x100] sm:$0xff]  ;;  %v874_v24 = vld [vmem:[%s2052_s9] sm:$0x7]  ;;  %s1073_s9 = sshll.u32 %s1722_s7, 4  ;;  %s1074_s9 = int_to_ptr.vmem [resolvable:$true] %s1073_s9 }
 0x3f1   :  { %v566_v31 = vsel %vm419_vm3, %v531_v53, %v565_v55  ;;  %v856_v53 = vld [vmem:[#allocation13 + $0xf0] sm:$0xff]  ;;  %s1629_s23 = scalar_lea.vmem %s1074_s9, 128  ;;  %p1634_p1 = scmp.lt.s32.totalorder %s1074_s9, %s1074_s9 }
 0x3f2   :  { %v553_v61 = vadd.f32 %v552_v56, %v551_v51  ;;  %v543_v62 = vadd.f32 %v542_v58, %v541_v54  ;;  %v567_v3 = vsel %vm421_vm4, %v537_v59, %v566_v31  ;;  %v860_v51 = vld [vmem:[#allocation13 + $0x110] sm:$0xff]  ;;  %v1409_v54 = vpack.c.bf16 %v855_v49, %v852_v48  ;;  %v859_v56 = vld [vmem:[#allocation13 + $0x108] sm:$0xff]  ;;  %v861_v58 = vld [vmem:[#allocation13 + $0x118] sm:$0xff]  ;;  %p1630_p0 = scmp.ne.s32.totalorder %s1074_s9, %s1629_s23  ;;  %p1635_p2 = scmp.lt.s32.totalorder %s1629_s23, %s1629_s23 }
 0x3f3   :  { %v1384_v55 = vpack.c.bf16 %v860_v51, %v857_v50  ;;  %v863_v31 = vld [vmem:[#allocation13 + $0x128] sm:$0xff]  ;;  %v866_v59 = vld [vmem:[#allocation13 + $0x140] sm:$0xff]  ;;  %v1412_v63 = vpack.c.bf16 %v861_v58, %v858_v57 }
 0x3f4   :  { %v554_v2 = vrot.slane %v553_v61, 1  ;;  %v568_v9 = vsel %vm423_vm5, %v543_v62, %v567_v3  ;;  %v862_v62 = vld [vmem:[#allocation13 + $0x120] sm:$0xff]  ;;  %v865_v3 = vld [vmem:[#allocation13 + $0x138] sm:$0xff]  ;;  %p1636_p3 = por %p1635_p2, %p1634_p1 }
 0x3f5   :  { %v569_v14 = vsel %vm425_vm6, %v549_v8, %v568_v9  ;;  %v872_v8 = vld [vmem:[#allocation13 + $0x170] sm:$0xff]  ;;  %v1390_v9 = vpack.c.bf16 %v865_v3, %v862_v62 }
 0x3f6   :  { %v555_v13 = vadd.f32 %v554_v2, %v553_v61  ;;  %v1386_v61 = vpack.c.bf16 %v859_v56, %v856_v53  ;;  %v1388_v2 = vpack.c.bf16 %v866_v59, %v863_v31  ;;  %p1637_p4 = pnand %p1636_p3, %p1630_p0 }
 0x3f8   :  { %v570_v18 = vsel %vm427_vm7, %v555_v13, %v569_v14  ;;  %v1392_v13 = vpack.c.bf16 %v872_v8, %v869_v7  ;;  %v871_v14 = vld [vmem:[#allocation13 + $0x168] sm:$0xff] }
 0x3f9   :  { %749 = vmatprep.mubr.f32.mxu1 %v570_v18  ;;  %1055 = vst [vmem:[#allocation14 + $0x8] sm:$0xff] %v570_v18  ;;  %820 = vmatprep.mubr.f32.mxu0 %v570_v18 }
 0x3fa   :  { %750 = vmatmul.mubr.f32.vlgmr.msra.gmra.mrb[0].mxu1 %v1958_v11  ;;  %821 = vmatmul.mubr.f32.vlgmr.msra.gmra.mrb[2].mxu0 %v1958_v11  ;;  %v1374_v11 = vpack.c.bf16 %v841_v30, %v838_v26  ;;  %v677_v26 = vrot.slane %v668_v23, %v1932_v4 }
 0x3fb   :  { %1367 = vmatpush1.bf16.msra.mxu1 %v1366_v16  ;;  %1398 = vmatpush3.bf16.msra.mxu0 %v1397_v17  ;;  %v870_v16 = vld [vmem:[#allocation13 + $0x160] sm:$0xff]  ;;  %v1394_v17 = vpack.c.bf16 %v871_v14, %v868_v10 }
 0x3fc   :  { %1369 = vmatprep.subr.bf16.mxu1 %v1368_v19  ;;  %1399 = vmatprep.subr.bf16.mxu0 %v1718_v0  ;;  %v1418_v18 = vpack.c.bf16 %v873_v60, %v870_v16  ;;  %v1474_v19 = vld [vmem:[#allocation5] sm:$0xff] }
 0x3fd   :  { %955 = vmatprep.mubr.f32.mxu1 %v1720_v1  ;;  %1241 = vmatprep.mubr.msk.f32.mxu0 %vm1719_vm0, %v1720_v1  ;;  %v1380_v1 = vpack.c.bf16 %v854_v29, %v851_v43 }
 0x3ff   :  { %1371 = vmatpush1.bf16.msra.mxu1 %v1370_v25  ;;  %1401 = vmatpush3.bf16.msra.mxu0 %v1400_v27  ;;  %v673_v25 = vrot.slane %v668_v23, %v1904_v37  ;;  %v883_v27 = vrot.slane %v874_v24, %v1932_v4  ;;  %v681_v4 = vrot.slane %v668_v23, %v1944_v15 }
 0x400   :  { %1373 = vmatprep.subr.bf16.mxu1 %v1372_v28  ;;  %1402 = vmatprep.subr.bf16.mxu0 %v1718_v0 }
 0x401   :  { %v1422_v32 = vadd.f32 %v883_v27, %v677_v26 }
 0x403   :  { %1375 = vmatpush1.bf16.msra.mxu1 %v1374_v11  ;;  %1404 = vmatpush3.bf16.msra.mxu0 %v1403_v38 }
 0x404   :  { %1377 = vmatprep.subr.bf16.mxu1 %v1376_v39  ;;  %1405 = vmatprep.subr.bf16.mxu0 %v1718_v0 }
 0x407   :  { %1379 = vmatpush1.bf16.msra.mxu1 %v1378_v44  ;;  %1407 = vmatpush3.bf16.msra.mxu0 %v1406_v46 }
 0x408   :  { %1381 = vmatprep.subr.bf16.mxu1 %v1380_v1  ;;  %1408 = vmatprep.subr.bf16.mxu0 %v1718_v0 }
 0x40b   :  { %1383 = vmatpush1.bf16.msra.mxu1 %v1382_v52  ;;  %1410 = vmatpush3.bf16.msra.mxu0 %v1409_v54 }
 0x40c   :  { %1385 = vmatprep.subr.bf16.mxu1 %v1384_v55  ;;  %1411 = vmatprep.subr.bf16.mxu0 %v1718_v0 }
 0x40f   :  { %1387 = vmatpush1.bf16.msra.mxu1 %v1386_v61  ;;  %1413 = vmatpush3.bf16.msra.mxu0 %v1412_v63 }
 0x410   :  { %1389 = vmatprep.subr.bf16.mxu1 %v1388_v2  ;;  %1414 = vmatprep.subr.bf16.mxu0 %v1718_v0 }
 0x413   :  { %1391 = vmatpush1.bf16.msra.mxu1 %v1390_v9  ;;  %1416 = vmatpush3.bf16.msra.mxu0 %v1415_v12 }
 0x414   :  { %1393 = vmatprep.subr.bf16.mxu1 %v1392_v13  ;;  %1417 = vmatprep.subr.bf16.mxu0 %v1718_v0  ;;  %v879_v0 = vrot.slane %v874_v24, %v1904_v37  ;;  %v887_v37 = vrot.slane %v874_v24, %v1944_v15 }
 0x416   :  { %v1420_v28 = vadd.f32 %v879_v0, %v673_v25 }
 0x417   :  { %1395 = vmatpush1.bf16.msra.mxu1 %v1394_v17  ;;  %1419 = vmatpush3.bf16.msra.mxu0 %v1418_v18 }
 0x41a   :  { %956 = vmatmul.mubr.f32.vlgmr.msra.gmra.mrb[0].mxu1 %v1474_v19  ;;  %1242 = vmatmul.mubr.f32.vlgmr.msra.gmra.mrb[4].mxu0 %v1474_v19 }
 0x4cd   :  { %v1154_v20 = vpop.f32.mrb[2].mxu0 }
 0x4ce   :  { %v1155_v21 = vpop.f32.mrb[3].mxu0 }
 0x4cf   :  { %v1156_v22 = vadd.f32 %v1155_v21, %v1154_v20 }
 0x4d1   :  { %v823_v45 = vadd.f32 %v1156_v22, %v681_v4 }
 0x4ed   :  { %v957_v30 = vpop.f32.mrb[0].mxu1  ;;  %v1028_v33 = vpop.f32.mrb[4].mxu0 }
 0x4ee   :  { %v1421_v34 = vadd.f32 %v1420_v28, %v957_v30  ;;  %v959_v35 = vpop.f32.mrb[1].mxu1  ;;  %v1243_v11 = vpop.f32.mrb[5].mxu0  ;;  %v1029_v29 = vadd.f32 %v1028_v33, %v887_v37 }
 0x4ef   :  { %v1423_v38 = vadd.f32 %v1422_v32, %v959_v35 }
 0x4f0   :  { %v1103_v36 = vmul.f32 -1.442695, %v1421_v34 }
 0x4f1   :  { %v1104_v39 = vmul.f32 -1.442695, %v1423_v38 }
 0x4f2   :  { %1464 = vpow2.f32 %v1103_v36 }
 0x4f3   :  { %1466 = vpow2.f32 %v1104_v39 }
 0x4fc   :  { %v1465_v40 = vpop.eup %1464 }
 0x4fd   :  { %v1036_v41 = vadd.f32 1.0, %v1465_v40  ;;  %v1467_v42 = vpop.eup %1466 }
 0x4fe   :  { %v1043_v43 = vadd.f32 1.0, %v1467_v42 }
 0x4ff   :  { %1468 = vrcp.f32 %v1036_v41 }
 0x500   :  { %1470 = vrcp.f32 %v1043_v43 }
 0x509   :  { %v1469_v44 = vpop.eup %1468 }
 0x50a   :  { %v1046_v46 = vmul.f32 %v1469_v44, %v1029_v29  ;;  %v1471_v47 = vpop.eup %1470 }
 0x50b   :  { %v1049_v48 = vsub.f32 1.0, %v1471_v47  ;;  %v1051_v51 = vmul.f32 %v1474_v19, %v1471_v47 }
 0x50c   :  { %v1047_v1 = vadd.f32 %v1046_v46, %v823_v45 }
 0x50e   :  { %1472 = vtanh.f32 %v1047_v1 }
 0x518   :  { %v1473_v49 = vpop.eup %1472 }
 0x519   :  { %v1050_v50 = vmul.f32 %v1473_v49, %v1049_v48 }
 0x51b   :  { %v1052_v15 = vadd.f32 %v1051_v51, %v1050_v50 }
 0x51d   :  { %1053 = vst [vmem:[#allocation15] sm:$0xff] %v1052_v15  ;;  %1054 = vst [vmem:[#allocation14] sm:$0xff] %v1052_v15 }
 0x51e   :  { %1640 = shalt.err (!%p1637_p4)
}
 0x51f   :  { %s1641_s2 = scalar_lea.hbm %s2054_s11, 128 }
 0x520   :  { %p1642_p5 = scmp.ne.s32.totalorder %s2054_s11, %s1641_s2  ;;  %p1645_p6 = scmp.lt.u32.totalorder %s1641_s2, %s2054_s11 }
 0x522   :  { %p1647_p7 = pnand %p1645_p6, %p1642_p5 }
 0x524   :  { %1650 = shalt.err (!%p1647_p7)
}
 0x525   :  { %1076 = dma.vmem_to_hbm [thread:$0]  %s1074_s9, 128, %s2054_s11, [#allocation16]  }
 0x526   :  { %s1651_s26 = scalar_lea.vmem %s1993_s18, 384  ;;  %p1656_p9 = scmp.lt.s32.totalorder %s1993_s18, %s1993_s18 }
 0x527   :  { %p1652_p8 = scmp.ne.s32.totalorder %s1993_s18, %s1651_s26  ;;  %p1657_p10 = scmp.lt.s32.totalorder %s1651_s26, %s1651_s26 }
 0x529   :  { %p1658_p11 = por %p1657_p10, %p1656_p9 }
 0x52b   :  { %p1659_p12 = pnand %p1658_p11, %p1652_p8 }
 0x52d   :  { %1662 = shalt.err (!%p1659_p12)
}
 0x52e   :  { %s1663_s6 = scalar_lea.hbm %s2053_s10, 384 }
 0x52f   :  { %p1664_p13 = scmp.ne.s32.totalorder %s2053_s10, %s1663_s6  ;;  %p1667_p0 = scmp.lt.u32.totalorder %s1663_s6, %s2053_s10 }
 0x531   :  { %p1669_p1 = pnand %p1667_p0, %p1664_p13 }
 0x533   :  { %1672 = shalt.err (!%p1669_p1)
}
 0x534   :  { %1066 = dma.vmem_to_hbm [thread:$0]  %s1993_s18, 384, %s2053_s10, [#allocation4]  }
 0x535   :  { %s1673_s3 = scalar_lea.vmem %s1995_s21, 128  ;;  %p1678_p3 = scmp.lt.s32.totalorder %s1995_s21, %s1995_s21 }
 0x536   :  { %p1674_p2 = scmp.ne.s32.totalorder %s1995_s21, %s1673_s3  ;;  %p1679_p4 = scmp.lt.s32.totalorder %s1673_s3, %s1673_s3 }
 0x538   :  { %p1680_p5 = por %p1679_p4, %p1678_p3 }
 0x53a   :  { %p1681_p6 = pnand %p1680_p5, %p1674_p2 }
 0x53c   :  { %1684 = shalt.err (!%p1681_p6)
}
 0x53d   :  { %s1685_s7 = scalar_lea.hbm %s2055_s12, 128 }
 0x53e   :  { %p1686_p7 = scmp.ne.s32.totalorder %s2055_s12, %s1685_s7  ;;  %p1689_p8 = scmp.lt.u32.totalorder %s1685_s7, %s2055_s12 }
 0x540   :  { %p1691_p9 = pnand %p1689_p8, %p1686_p7 }
 0x542   :  { %1694 = shalt.err (!%p1691_p9)
}
 0x543   :  { %1086 = dma.vmem_to_hbm [thread:$0]  %s1995_s21, 128, %s2055_s12, [#allocation16]  }
 0x544   :  { %1703 = dma.done.wait [#allocation4], 384  }
 0x545   :  { %1704 = vsyncadd [#allocation4], 4294966912 }
 0x546   :  { %1705 = dma.done.wait [#allocation16], 256  }
 0x547   :  { %1706 = vsyncadd [#allocation16], 4294967040 }
 0x548   :  { %1096 = vsyncpa [#allocation3], 1 }
 0x549   :  { %1097 = vsyncpa [#allocation6], 1 }
 0x54a   :  { %1098 = vsyncpa [#allocation9], 1 }
 0x54b   :  { %1099 = vsyncpa [#allocation12], 1 }
 0x54c   :  { %1100 = vsyncpa [#allocation4], 1 }
 0x54d   :  { %1101 = vsyncpa [#allocation16], 1 }

</bundles_post_ra>
